<compile_context>
chip_gen: v7x
topology: tpu7x:2x2x1
jax: 0.10.0
libtpu: 0.0.40
codegen_flags: <defaults>
</compile_context>

<pallas_src>
import math
import functools

import jax
import jax.numpy as jnp
import numpy as np
from jax.experimental import pallas as pl
from jax.experimental.pallas import tpu as pltpu


# ----------------------------- Pallas kernel --------------------------------

def bert_encoder_kernel(x_ref, mask_ref,
                        wq_ref, bq_ref, wk_ref, bk_ref, wv_ref, bv_ref,
                        wo_ref, bo_ref, ln1_g_ref, ln1_b_ref,
                        wi_ref, bi_ref, w2_ref, b2_ref, ln2_g_ref, ln2_b_ref,
                        out_ref,
                        h_ref, ctx_ref,
                        *, num_heads, head_size, eps):
    layer = pl.program_id(1)

    # First layer of each batch element: seed the resident hidden-state carry.
    @pl.when(layer == 0)
    def _():
        h_ref[...] = x_ref[0]

    x = h_ref[...]                       # (S, H) f32 hidden state = this layer's input
    mask = mask_ref[0]                   # (1, S) additive attention mask

    # ---- QKV projections: bf16 MXU inputs, f32 accumulation, f32 bias add ----
    x_bf = x.astype(jnp.bfloat16)
    q = jnp.dot(x_bf, wq_ref[...], preferred_element_type=jnp.float32) + bq_ref[...]
    k = jnp.dot(x_bf, wk_ref[...], preferred_element_type=jnp.float32) + bk_ref[...]
    v = jnp.dot(x_bf, wv_ref[...], preferred_element_type=jnp.float32) + bv_ref[...]

    # ---- split heads: (S, H) -> (NH, S, dh) using static lane slices + major-dim stack
    def split_heads(t):
        return jnp.stack(
            [t[:, h * head_size:(h + 1) * head_size] for h in range(num_heads)],
            axis=0)

    q3 = split_heads(q).astype(jnp.bfloat16)
    k3 = split_heads(k).astype(jnp.bfloat16)
    v3 = split_heads(v).astype(jnp.bfloat16)

    # ---- attention: one batched matmul over all heads, no explicit K transpose ----
    scores = jnp.einsum('hqd,hkd->hqk', q3, k3,
                        preferred_element_type=jnp.float32)          # (NH, S, S)
    scores = scores * (1.0 / math.sqrt(head_size)) + mask            # (1,S) broadcasts
    scores = scores - jnp.max(scores, axis=-1, keepdims=True)        # stable softmax
    e = jnp.exp(scores)
    probs = e * pl.reciprocal(jnp.sum(e, axis=-1, keepdims=True), approx=True)
    ctx3 = jnp.einsum('hqk,hkd->hqd', probs.astype(jnp.bfloat16), v3,
                      preferred_element_type=jnp.float32)            # (NH, S, dh)

    # Merge heads back to (S, H).  ctx_ref persists across grid steps but every head
    # slice is rewritten before ctx_ref is read, so no re-init is needed.
    for h in range(num_heads):
        ctx_ref[:, h * head_size:(h + 1) * head_size] = ctx3[h]
    ctx = ctx_ref[...]

    def layer_norm(t, g_ref, b_ref):
        # single pass: mean and mean-of-squares, rsqrt on the EUP
        u = jnp.mean(t, axis=-1, keepdims=True)
        m2 = jnp.mean(t * t, axis=-1, keepdims=True)
        inv = jax.lax.rsqrt(m2 - u * u + eps)
        return g_ref[...] * ((t - u) * inv) + b_ref[...]

    # ---- attention output dense + residual + LayerNorm ----
    attn = jnp.dot(ctx.astype(jnp.bfloat16), wo_ref[...],
                   preferred_element_type=jnp.float32) + bo_ref[...]
    h1 = layer_norm(attn + x, ln1_g_ref, ln1_b_ref)

    # ---- intermediate dense + exact (erf) GELU (f32 elementwise) ----
    inter = jnp.dot(h1.astype(jnp.bfloat16), wi_ref[...],
                    preferred_element_type=jnp.float32) + bi_ref[...]
    inter = inter * 0.5 * (1.0 + jax.lax.erf(inter * (1.0 / math.sqrt(2.0))))

    # ---- output dense + residual + LayerNorm ----
    o2 = jnp.dot(inter.astype(jnp.bfloat16), w2_ref[...],
                 preferred_element_type=jnp.float32) + b2_ref[...]
    h2 = layer_norm(o2 + h1, ln2_g_ref, ln2_b_ref)

    h_ref[...] = h2           # carry to next layer (stays in VMEM)
    out_ref[0, 0] = h2        # all_encoder_layers[layer] for this batch element


# ------------------------------ Encoder wrapper -------------------------------

def bert_encoder_pallas(x, mask3, params, *, num_layers, num_heads, eps=1e-12):
    """Fused BERTEncoder.forward: x (B,S,H) f32, mask3 (B,1,S) additive f32.
    Returns the list of per-layer hidden states."""
    B, S, H = x.shape
    I = params['wi'].shape[1]
    head_size = H // num_heads

    wbf = lambda name: params[name].astype(jnp.bfloat16)   # matmul weights -> bf16
    f32 = lambda name: params[name].astype(jnp.float32)    # biases / LN params stay f32

    kernel = functools.partial(bert_encoder_kernel, num_heads=num_heads,
                               head_size=head_size, eps=eps)

    def const_spec(shape):
        rank = len(shape)
        return pl.BlockSpec(shape, lambda b, l, _r=rank: (0,) * _r)

    in_specs = [
        pl.BlockSpec((1, S, H), lambda b, l: (b, 0, 0)),   # layer-0 hidden states
        pl.BlockSpec((1, 1, S), lambda b, l: (b, 0, 0)),   # additive attention mask
        const_spec((H, H)), const_spec((1, H)),            # Wq, bq
        const_spec((H, H)), const_spec((1, H)),            # Wk, bk
        const_spec((H, H)), const_spec((1, H)),            # Wv, bv
        const_spec((H, H)), const_spec((1, H)),            # Wo, bo
        const_spec((1, H)), const_spec((1, H)),            # ln1 gamma, beta
        const_spec((H, I)), const_spec((1, I)),            # Wi, bi
        const_spec((I, H)), const_spec((1, H)),            # W2, b2
        const_spec((1, H)), const_spec((1, H)),            # ln2 gamma, beta
    ]

    # Scheduler hint + explicit VMEM budget.
    flops_step = 2 * S * H * H * 4 + 2 * S * H * I * 2 + 4 * S * S * H
    transc_step = num_heads * S * S + S * I + num_heads * S + 2 * S
    w_bytes = 2 * (4 * H * H + 2 * H * I) + 4 * (9 * H + I)          # bf16 W + f32 small
    cost = pl.CostEstimate(
        flops=B * num_layers * flops_step,
        transcendentals=B * num_layers * transc_step,
        bytes_accessed=w_bytes + B * S * H * 4 + B * S * 4 + num_layers * B * S * H * 4)

    act_bytes = 4 * (8 * S * H + 3 * num_heads * S * S + 2 * S * I)
    # NOTE: cap nearer 48 MiB when targeting v7x (64 MiB physical VMEM).
    vmem_bytes = int(min(max((2 * w_bytes + 4 * 4 * S * H + act_bytes) * 5 // 4,
                             16 * 2 ** 20), 100 * 2 ** 20))

    out = pl.pallas_call(
        kernel,
        out_shape=jax.ShapeDtypeStruct((num_layers, B, S, H), jnp.float32),
        grid_spec=pltpu.PrefetchScalarGridSpec(
            num_scalar_prefetch=0,
            grid=(B, num_layers),
            in_specs=in_specs,
            out_specs=pl.BlockSpec((1, 1, S, H), lambda b, l: (l, b, 0, 0)),
            scratch_shapes=[pltpu.VMEM((S, H), jnp.float32),    # hidden-state carry
                            pltpu.VMEM((S, H), jnp.float32)],   # merged attention ctx
        ),
        compiler_params=pltpu.CompilerParams(
            dimension_semantics=("parallel", "arbitrary"),
            vmem_limit_bytes=vmem_bytes),
        cost_estimate=cost,
    )(x, mask3,
      wbf('wq'), f32('bq'), wbf('wk'), f32('bk'), wbf('wv'), f32('bv'),
      wbf('wo'), f32('bo'), f32('ln1_g'), f32('ln1_b'),
      wbf('wi'), f32('bi'), wbf('w2'), f32('b2'), f32('ln2_g'), f32('ln2_b'))

    return [out[l] for l in range(num_layers)]


# --------------------- Plain-JAX pieces around the kernel ---------------------

def layer_norm_ref(x, gamma, beta, eps=1e-12):
    u = jnp.mean(x, axis=-1, keepdims=True)
    s = jnp.mean((x - u) ** 2, axis=-1, keepdims=True)
    return gamma * ((x - u) / jnp.sqrt(s + eps)) + beta


def bert_embeddings(input_ids, token_type_ids, params, eps=1e-12):
    # TODO(synk): embedding-table gathers + this tiny LayerNorm stay in plain JAX; a
    # data-dependent Pallas gather kernel adds nothing at these sizes.
    S = input_ids.shape[1]
    position_ids = jnp.arange(S, dtype=jnp.int32)[None, :]
    emb = (params['word_emb'][input_ids]
           + params['pos_emb'][position_ids]
           + params['type_emb'][token_type_ids])
    return layer_norm_ref(emb, params['emb_ln_g'], params['emb_ln_b'], eps)


def bert_qa_forward(input_ids, token_type_ids, attention_mask, params, *,
                    num_layers, num_heads):
    """BertForQuestionAnswering.forward (inference path)."""
    emb = bert_embeddings(input_ids, token_type_ids, params)
    ext = (1.0 - attention_mask.astype(jnp.float32)) * -1000000.0   # matches BertModel
    mask3 = ext[:, None, :]                                          # (B, 1, S)
    layers = bert_encoder_pallas(emb, mask3, params,
                                 num_layers=num_layers, num_heads=num_heads)
    sequence_output = layers[-1]
    # TODO(synk): qa_outputs (H->2) and the unused BERTPooler stay in plain JAX; a
    # 2-lane-wide Pallas output would be pure masked-store overhead.
    logits = sequence_output @ params['qa_w'] + params['qa_b']
    return layers, logits[..., 0], logits[..., 1]


# --------------------------- Pure-JAX reference -------------------------------

def bert_layer_ref(x, mask3, p, *, num_heads, eps=1e-12):
    B, S, H = x.shape
    dh = H // num_heads

    def split(t):
        return t.reshape(B, S, num_heads, dh).transpose(0, 2, 1, 3)

    q = split(x @ p['wq'] + p['bq'])
    k = split(x @ p['wk'] + p['bk'])
    v = split(x @ p['wv'] + p['bv'])
    scores = jnp.einsum('bhqd,bhkd->bhqk', q, k) / math.sqrt(dh)
    scores = scores + mask3[:, None, :, :]
    probs = jax.nn.softmax(scores, axis=-1)
    ctx = jnp.einsum('bhqk,bhkd->bhqd', probs, v)
    ctx = ctx.transpose(0, 2, 1, 3).reshape(B, S, H)

    h1 = layer_norm_ref(ctx @ p['wo'] + p['bo'] + x, p['ln1_g'], p['ln1_b'], eps)
    inter = h1 @ p['wi'] + p['bi']
    inter = inter * 0.5 * (1.0 + jax.lax.erf(inter / math.sqrt(2.0)))
    h2 = layer_norm_ref(inter @ p['w2'] + p['b2'] + h1, p['ln2_g'], p['ln2_b'], eps)
    return h2


def bert_qa_ref(input_ids, token_type_ids, attention_mask, params, *,
                num_layers, num_heads):
    emb = bert_embeddings(input_ids, token_type_ids, params)
    mask3 = ((1.0 - attention_mask.astype(jnp.float32)) * -1000000.0)[:, None, :]
    h = emb
    layers = []
    for _ in range(num_layers):
        h = bert_layer_ref(h, mask3, params, num_heads=num_heads)
        layers.append(h)
    logits = layers[-1] @ params['qa_w'] + params['qa_b']
    return layers, logits[..., 0], logits[..., 1]


# --------------------------------- Main ---------------------------------------

if __name__ == "__main__":
    # Small config consistent with BertConfig semantics.
    V, P, T = 128, 64, 2                   # vocab, max positions, type vocab
    B, S, H, NH, I, L = 2, 8, 32, 4, 64, 2  # batch, seq, hidden, heads, intermediate, layers

    key = jax.random.PRNGKey(0)
    ks = jax.random.split(key, 24)
    std = 0.02
    n = lambda i, shape: jax.random.normal(ks[i], shape, jnp.float32)

    params = {
        'word_emb': n(0, (V, H)) * std,
        'pos_emb':  n(1, (P, H)) * std,
        'type_emb': n(2, (T, H)) * std,
        'emb_ln_g': 1.0 + 0.1 * n(3, (1, H)),
        'emb_ln_b': std * n(4, (1, H)),
        'wq': n(5, (H, H)) * std,  'bq': std * n(6, (1, H)),
        'wk': n(7, (H, H)) * std,  'bk': std * n(8, (1, H)),
        'wv': n(9, (H, H)) * std,  'bv': std * n(10, (1, H)),
        'wo': n(11, (H, H)) * std, 'bo': std * n(12, (1, H)),
        'ln1_g': 1.0 + 0.1 * n(13, (1, H)), 'ln1_b': std * n(14, (1, H)),
        'wi': n(15, (H, I)) * std, 'bi': std * n(16, (1, I)),
        'w2': n(17, (I, H)) * std, 'b2': std * n(18, (1, H)),
        'ln2_g': 1.0 + 0.1 * n(19, (1, H)), 'ln2_b': std * n(20, (1, H)),
        'qa_w': n(21, (H, 2)) * std, 'qa_b': jnp.zeros((2,), jnp.float32),
    }

    input_ids = jax.random.randint(ks[22], (B, S), 0, V, dtype=jnp.int32)
    token_type_ids = jax.random.randint(ks[23], (B, S), 0, T, dtype=jnp.int32)
    # Last two tokens of every sequence are padding (mask = 0).
    attention_mask = jnp.concatenate(
        [jnp.ones((B, S - 2), jnp.float32), jnp.zeros((B, 2), jnp.float32)], axis=-1)

    # Pallas forward.
    layers, start_logits, end_logits = bert_qa_forward(
        input_ids, token_type_ids, attention_mask, params,
        num_layers=L, num_heads=NH)
    layers = [jax.block_until_ready(h) for h in layers]
    start_logits = jax.block_until_ready(start_logits)
    end_logits = jax.block_until_ready(end_logits)

    # Pure-JAX (f32) reference; tolerance absorbs bf16-MXU / approx-reciprocal rounding.
    ref_layers, ref_start, ref_end = bert_qa_ref(
        input_ids, token_type_ids, attention_mask, params,
        num_layers=L, num_heads=NH)

    for li in range(L):
        np.testing.assert_allclose(np.asarray(layers[li]), np.asarray(ref_layers[li]),
                                   rtol=2e-2, atol=2e-2)
    np.testing.assert_allclose(np.asarray(start_logits), np.asarray(ref_start),
                               rtol=2e-2, atol=2e-2)
    np.testing.assert_allclose(np.asarray(end_logits), np.asarray(ref_end),
                               rtol=2e-2, atol=2e-2)

    print("KERNEL_OK")
</pallas_src>

<mosaic_0001>
module attributes {stable_mosaic.version = 11 : i64} {
  func.func @bert_encoder_kernel(%arg0: i32, %arg1: i32, %arg2: memref<1x8x32xf32, #tpu.memory_space<vmem>>, %arg3: memref<1x1x8xf32, #tpu.memory_space<vmem>>, %arg4: memref<32x32xbf16, #tpu.memory_space<vmem>>, %arg5: memref<1x32xf32, #tpu.memory_space<vmem>>, %arg6: memref<32x32xbf16, #tpu.memory_space<vmem>>, %arg7: memref<1x32xf32, #tpu.memory_space<vmem>>, %arg8: memref<32x32xbf16, #tpu.memory_space<vmem>>, %arg9: memref<1x32xf32, #tpu.memory_space<vmem>>, %arg10: memref<32x32xbf16, #tpu.memory_space<vmem>>, %arg11: memref<1x32xf32, #tpu.memory_space<vmem>>, %arg12: memref<1x32xf32, #tpu.memory_space<vmem>>, %arg13: memref<1x32xf32, #tpu.memory_space<vmem>>, %arg14: memref<32x64xbf16, #tpu.memory_space<vmem>>, %arg15: memref<1x64xf32, #tpu.memory_space<vmem>>, %arg16: memref<64x32xbf16, #tpu.memory_space<vmem>>, %arg17: memref<1x32xf32, #tpu.memory_space<vmem>>, %arg18: memref<1x32xf32, #tpu.memory_space<vmem>>, %arg19: memref<1x32xf32, #tpu.memory_space<vmem>>, %arg20: memref<1x1x8x32xf32, #tpu.memory_space<vmem>>, %arg21: memref<8x32xf32, #tpu.memory_space<vmem>>, %arg22: memref<8x32xf32, #tpu.memory_space<vmem>>) attributes {dimension_semantics = [#tpu.dimension_semantics<parallel>, #tpu.dimension_semantics<arbitrary>], iteration_bounds = array<i64: 2, 2>, scalar_prefetch = 0 : i64, scratch_operands = 2 : i64, tpu.core_type = #tpu.core_type<tc>, window_params = [{transform_indices = @transform_0, window_bounds = array<i64: 1, 8, 32>}, {transform_indices = @transform_1, window_bounds = array<i64: 1, 1, 8>}, {pipeline_mode = #tpu.pipeline_mode<synchronous>, transform_indices = @transform_2, window_bounds = array<i64: 32, 32>}, {pipeline_mode = #tpu.pipeline_mode<synchronous>, transform_indices = @transform_3, window_bounds = array<i64: 1, 32>}, {pipeline_mode = #tpu.pipeline_mode<synchronous>, transform_indices = @transform_4, window_bounds = array<i64: 32, 32>}, {pipeline_mode = #tpu.pipeline_mode<synchronous>, transform_indices = @transform_5, window_bounds = array<i64: 1, 32>}, {pipeline_mode = #tpu.pipeline_mode<synchronous>, transform_indices = @transform_6, window_bounds = array<i64: 32, 32>}, {pipeline_mode = #tpu.pipeline_mode<synchronous>, transform_indices = @transform_7, window_bounds = array<i64: 1, 32>}, {pipeline_mode = #tpu.pipeline_mode<synchronous>, transform_indices = @transform_8, window_bounds = array<i64: 32, 32>}, {pipeline_mode = #tpu.pipeline_mode<synchronous>, transform_indices = @transform_9, window_bounds = array<i64: 1, 32>}, {pipeline_mode = #tpu.pipeline_mode<synchronous>, transform_indices = @transform_10, window_bounds = array<i64: 1, 32>}, {pipeline_mode = #tpu.pipeline_mode<synchronous>, transform_indices = @transform_11, window_bounds = array<i64: 1, 32>}, {pipeline_mode = #tpu.pipeline_mode<synchronous>, transform_indices = @transform_12, window_bounds = array<i64: 32, 64>}, {pipeline_mode = #tpu.pipeline_mode<synchronous>, transform_indices = @transform_13, window_bounds = array<i64: 1, 64>}, {pipeline_mode = #tpu.pipeline_mode<synchronous>, transform_indices = @transform_14, window_bounds = array<i64: 64, 32>}, {pipeline_mode = #tpu.pipeline_mode<synchronous>, transform_indices = @transform_15, window_bounds = array<i64: 1, 32>}, {pipeline_mode = #tpu.pipeline_mode<synchronous>, transform_indices = @transform_16, window_bounds = array<i64: 1, 32>}, {pipeline_mode = #tpu.pipeline_mode<synchronous>, transform_indices = @transform_17, window_bounds = array<i64: 1, 32>}, {transform_indices = @transform_18, window_bounds = array<i64: 1, 1, 8, 32>}]} {
    %c0_i32 = arith.constant 0 : i32
    %0 = arith.cmpi eq, %arg1, %c0_i32 : i32
    %1 = arith.extui %0 : i1 to i32
    %c0_i32_0 = arith.constant 0 : i32
    %2 = arith.cmpi ne, %1, %c0_i32_0 : i32
    scf.if %2 {
      %c0_73 = arith.constant 0 : index
      %c0_74 = arith.constant 0 : index
      %c0_75 = arith.constant 0 : index
      %163 = vector.load %arg2[%c0_73, %c0_74, %c0_75] : memref<1x8x32xf32, #tpu.memory_space<vmem>>, vector<1x8x32xf32>
      %164 = vector.shape_cast %163 : vector<1x8x32xf32> to vector<8x32xf32>
      %c0_76 = arith.constant 0 : index
      %c0_77 = arith.constant 0 : index
      %165 = vector.load %arg21[%c0_76, %c0_77] : memref<8x32xf32, #tpu.memory_space<vmem>>, vector<8x32xf32>
      tpu.vector_store %arg21[%c0_76, %c0_77], %164 {strides = array<i32>} : memref<8x32xf32, #tpu.memory_space<vmem>>, vector<8x32xf32>,
    } else {
    }
    %c0 = arith.constant 0 : index
    %c0_1 = arith.constant 0 : index
    %3 = vector.load %arg21[%c0, %c0_1] : memref<8x32xf32, #tpu.memory_space<vmem>>, vector<8x32xf32>
    %c0_2 = arith.constant 0 : index
    %c0_3 = arith.constant 0 : index
    %c0_4 = arith.constant 0 : index
    %4 = vector.load %arg3[%c0_2, %c0_3, %c0_4] : memref<1x1x8xf32, #tpu.memory_space<vmem>>, vector<1x1x8xf32>
    %5 = vector.shape_cast %4 : vector<1x1x8xf32> to vector<1x8xf32>
    %6 = arith.truncf %3 : vector<8x32xf32> to vector<8x32xbf16>
    %c0_5 = arith.constant 0 : index
    %c0_6 = arith.constant 0 : index
    %7 = vector.load %arg4[%c0_5, %c0_6] : memref<32x32xbf16, #tpu.memory_space<vmem>>, vector<32x32xbf16>
    %cst = arith.constant dense<0.000000e+00> : vector<8x32xf32>
    %8 = tpu.matmul %6, %7, %cst {dimension_numbers = #tpu.dot_dimension_numbers<[1], [0], [0], [1], [0, 0, 1, 1], [], []>} : vector<8x32xbf16>, vector<32x32xbf16>, vector<8x32xf32> -> vector<8x32xf32>
    %c0_7 = arith.constant 0 : index
    %c0_8 = arith.constant 0 : index
    %9 = vector.load %arg5[%c0_7, %c0_8] : memref<1x32xf32, #tpu.memory_space<vmem>>, vector<1x32xf32>
    %10 = vector.broadcast %9 : vector<1x32xf32> to vector<8x32xf32>
    %11 = arith.addf %8, %10 : vector<8x32xf32>
    %c0_9 = arith.constant 0 : index
    %c0_10 = arith.constant 0 : index
    %12 = vector.load %arg6[%c0_9, %c0_10] : memref<32x32xbf16, #tpu.memory_space<vmem>>, vector<32x32xbf16>
    %cst_11 = arith.constant dense<0.000000e+00> : vector<8x32xf32>
    %13 = tpu.matmul %6, %12, %cst_11 {dimension_numbers = #tpu.dot_dimension_numbers<[1], [0], [0], [1], [0, 0, 1, 1], [], []>} : vector<8x32xbf16>, vector<32x32xbf16>, vector<8x32xf32> -> vector<8x32xf32>
    %c0_12 = arith.constant 0 : index
    %c0_13 = arith.constant 0 : index
    %14 = vector.load %arg7[%c0_12, %c0_13] : memref<1x32xf32, #tpu.memory_space<vmem>>, vector<1x32xf32>
    %15 = vector.broadcast %14 : vector<1x32xf32> to vector<8x32xf32>
    %16 = arith.addf %13, %15 : vector<8x32xf32>
    %c0_14 = arith.constant 0 : index
    %c0_15 = arith.constant 0 : index
    %17 = vector.load %arg8[%c0_14, %c0_15] : memref<32x32xbf16, #tpu.memory_space<vmem>>, vector<32x32xbf16>
    %cst_16 = arith.constant dense<0.000000e+00> : vector<8x32xf32>
    %18 = tpu.matmul %6, %17, %cst_16 {dimension_numbers = #tpu.dot_dimension_numbers<[1], [0], [0], [1], [0, 0, 1, 1], [], []>} : vector<8x32xbf16>, vector<32x32xbf16>, vector<8x32xf32> -> vector<8x32xf32>
    %c0_17 = arith.constant 0 : index
    %c0_18 = arith.constant 0 : index
    %19 = vector.load %arg9[%c0_17, %c0_18] : memref<1x32xf32, #tpu.memory_space<vmem>>, vector<1x32xf32>
    %20 = vector.broadcast %19 : vector<1x32xf32> to vector<8x32xf32>
    %21 = arith.addf %18, %20 : vector<8x32xf32>
    %22 = vector.extract_strided_slice %11 {offsets = [0, 0], sizes = [8, 8], strides = [1, 1]} : vector<8x32xf32> to vector<8x8xf32>
    %23 = vector.extract_strided_slice %11 {offsets = [0, 8], sizes = [8, 8], strides = [1, 1]} : vector<8x32xf32> to vector<8x8xf32>
    %24 = vector.extract_strided_slice %11 {offsets = [0, 16], sizes = [8, 8], strides = [1, 1]} : vector<8x32xf32> to vector<8x8xf32>
    %25 = vector.extract_strided_slice %11 {offsets = [0, 24], sizes = [8, 8], strides = [1, 1]} : vector<8x32xf32> to vector<8x8xf32>
    %26 = vector.shape_cast %22 : vector<8x8xf32> to vector<1x8x8xf32>
    %27 = vector.shape_cast %23 : vector<8x8xf32> to vector<1x8x8xf32>
    %28 = vector.shape_cast %24 : vector<8x8xf32> to vector<1x8x8xf32>
    %29 = vector.shape_cast %25 : vector<8x8xf32> to vector<1x8x8xf32>
    %30 = tpu.concatenate %26, %27, %28, %29 in 0 : vector<1x8x8xf32>, vector<1x8x8xf32>, vector<1x8x8xf32>, vector<1x8x8xf32> -> vector<4x8x8xf32>
    %31 = arith.truncf %30 : vector<4x8x8xf32> to vector<4x8x8xbf16>
    %32 = vector.extract_strided_slice %16 {offsets = [0, 0], sizes = [8, 8], strides = [1, 1]} : vector<8x32xf32> to vector<8x8xf32>
    %33 = vector.extract_strided_slice %16 {offsets = [0, 8], sizes = [8, 8], strides = [1, 1]} : vector<8x32xf32> to vector<8x8xf32>
    %34 = vector.extract_strided_slice %16 {offsets = [0, 16], sizes = [8, 8], strides = [1, 1]} : vector<8x32xf32> to vector<8x8xf32>
    %35 = vector.extract_strided_slice %16 {offsets = [0, 24], sizes = [8, 8], strides = [1, 1]} : vector<8x32xf32> to vector<8x8xf32>
    %36 = vector.shape_cast %32 : vector<8x8xf32> to vector<1x8x8xf32>
    %37 = vector.shape_cast %33 : vector<8x8xf32> to vector<1x8x8xf32>
    %38 = vector.shape_cast %34 : vector<8x8xf32> to vector<1x8x8xf32>
    %39 = vector.shape_cast %35 : vector<8x8xf32> to vector<1x8x8xf32>
    %40 = tpu.concatenate %36, %37, %38, %39 in 0 : vector<1x8x8xf32>, vector<1x8x8xf32>, vector<1x8x8xf32>, vector<1x8x8xf32> -> vector<4x8x8xf32>
    %41 = arith.truncf %40 : vector<4x8x8xf32> to vector<4x8x8xbf16>
    %42 = vector.extract_strided_slice %21 {offsets = [0, 0], sizes = [8, 8], strides = [1, 1]} : vector<8x32xf32> to vector<8x8xf32>
    %43 = vector.extract_strided_slice %21 {offsets = [0, 8], sizes = [8, 8], strides = [1, 1]} : vector<8x32xf32> to vector<8x8xf32>
    %44 = vector.extract_strided_slice %21 {offsets = [0, 16], sizes = [8, 8], strides = [1, 1]} : vector<8x32xf32> to vector<8x8xf32>
    %45 = vector.extract_strided_slice %21 {offsets = [0, 24], sizes = [8, 8], strides = [1, 1]} : vector<8x32xf32> to vector<8x8xf32>
    %46 = vector.shape_cast %42 : vector<8x8xf32> to vector<1x8x8xf32>
    %47 = vector.shape_cast %43 : vector<8x8xf32> to vector<1x8x8xf32>
    %48 = vector.shape_cast %44 : vector<8x8xf32> to vector<1x8x8xf32>
    %49 = vector.shape_cast %45 : vector<8x8xf32> to vector<1x8x8xf32>
    %50 = tpu.concatenate %46, %47, %48, %49 in 0 : vector<1x8x8xf32>, vector<1x8x8xf32>, vector<1x8x8xf32>, vector<1x8x8xf32> -> vector<4x8x8xf32>
    %51 = arith.truncf %50 : vector<4x8x8xf32> to vector<4x8x8xbf16>
    "tpu.trace_start"() <{level = 10 : i32, message = "hqd,hkd->hqk"}> : () -> ()
    %cst_19 = arith.constant dense<0.000000e+00> : vector<4x8x8xf32>
    %52 = tpu.matmul %31, %41, %cst_19 {dimension_numbers = #tpu.dot_dimension_numbers<[2], [2], [1], [1], [0, 0, 0, 1, 1, 1], [0], [0]>} : vector<4x8x8xbf16>, vector<4x8x8xbf16>, vector<4x8x8xf32> -> vector<4x8x8xf32>
    "tpu.trace_stop"() : () -> ()
    %cst_20 = arith.constant 0.353553385 : f32
    %53 = vector.broadcast %cst_20 : f32 to vector<4x8x8xf32>
    %54 = arith.mulf %52, %53 : vector<4x8x8xf32>
    %55 = vector.shape_cast %5 : vector<1x8xf32> to vector<1x1x8xf32>
    %56 = vector.broadcast %55 : vector<1x1x8xf32> to vector<4x8x8xf32>
    %57 = arith.addf %54, %56 : vector<4x8x8xf32>
    %cst_21 = arith.constant dense<0xFF800000> : vector<4x8xf32>
    %58 = vector.multi_reduction <maximumf>, %57, %cst_21 [2] : vector<4x8x8xf32> to vector<4x8xf32>
    %59 = vector.shape_cast %58 : vector<4x8xf32> to vector<4x8x1xf32>
    %60 = vector.broadcast %59 : vector<4x8x1xf32> to vector<4x8x8xf32>
    %61 = arith.subf %57, %60 : vector<4x8x8xf32>
    %62 = math.exp %61 : vector<4x8x8xf32>
    %cst_22 = arith.constant dense<0.000000e+00> : vector<4x8xf32>
    %63 = vector.multi_reduction <add>, %62, %cst_22 [2] : vector<4x8x8xf32> to vector<4x8xf32>
    %64 = vector.shape_cast %63 : vector<4x8xf32> to vector<4x8x1xf32>
    %65 = tpu.reciprocal %64 {approx = true} : vector<4x8x1xf32> -> vector<4x8x1xf32>
    %66 = vector.broadcast %65 : vector<4x8x1xf32> to vector<4x8x8xf32>
    %67 = arith.mulf %62, %66 : vector<4x8x8xf32>
    %68 = arith.truncf %67 : vector<4x8x8xf32> to vector<4x8x8xbf16>
    "tpu.trace_start"() <{level = 10 : i32, message = "hqk,hkd->hqd"}> : () -> ()
    %cst_23 = arith.constant dense<0.000000e+00> : vector<4x8x8xf32>
    %69 = tpu.matmul %68, %51, %cst_23 {dimension_numbers = #tpu.dot_dimension_numbers<[2], [1], [1], [2], [0, 0, 0, 1, 1, 2], [0], [0]>} : vector<4x8x8xbf16>, vector<4x8x8xbf16>, vector<4x8x8xf32> -> vector<4x8x8xf32>
    "tpu.trace_stop"() : () -> ()
    %70 = vector.extract_strided_slice %69 {offsets = [0, 0, 0], sizes = [1, 8, 8], strides = [1, 1, 1]} : vector<4x8x8xf32> to vector<1x8x8xf32>
    %71 = vector.shape_cast %70 : vector<1x8x8xf32> to vector<8x8xf32>
    %c0_24 = arith.constant 0 : index
    %c0_25 = arith.constant 0 : index
    %72 = vector.load %arg22[%c0_24, %c0_25] : memref<8x32xf32, #tpu.memory_space<vmem>>, vector<8x8xf32>
    tpu.vector_store %arg22[%c0_24, %c0_25], %71 {strides = array<i32>} : memref<8x32xf32, #tpu.memory_space<vmem>>, vector<8x8xf32>,
    %73 = vector.extract_strided_slice %69 {offsets = [1, 0, 0], sizes = [1, 8, 8], strides = [1, 1, 1]} : vector<4x8x8xf32> to vector<1x8x8xf32>
    %74 = vector.shape_cast %73 : vector<1x8x8xf32> to vector<8x8xf32>
    %c0_26 = arith.constant 0 : index
    %c8 = arith.constant 8 : index
    %75 = vector.load %arg22[%c0_26, %c8] : memref<8x32xf32, #tpu.memory_space<vmem>>, vector<8x8xf32>
    tpu.vector_store %arg22[%c0_26, %c8], %74 {strides = array<i32>} : memref<8x32xf32, #tpu.memory_space<vmem>>, vector<8x8xf32>,
    %76 = vector.extract_strided_slice %69 {offsets = [2, 0, 0], sizes = [1, 8, 8], strides = [1, 1, 1]} : vector<4x8x8xf32> to vector<1x8x8xf32>
    %77 = vector.shape_cast %76 : vector<1x8x8xf32> to vector<8x8xf32>
    %c0_27 = arith.constant 0 : index
    %c16 = arith.constant 16 : index
    %78 = vector.load %arg22[%c0_27, %c16] : memref<8x32xf32, #tpu.memory_space<vmem>>, vector<8x8xf32>
    tpu.vector_store %arg22[%c0_27, %c16], %77 {strides = array<i32>} : memref<8x32xf32, #tpu.memory_space<vmem>>, vector<8x8xf32>,
    %79 = vector.extract_strided_slice %69 {offsets = [3, 0, 0], sizes = [1, 8, 8], strides = [1, 1, 1]} : vector<4x8x8xf32> to vector<1x8x8xf32>
    %80 = vector.shape_cast %79 : vector<1x8x8xf32> to vector<8x8xf32>
    %c0_28 = arith.constant 0 : index
    %c24 = arith.constant 24 : index
    %81 = vector.load %arg22[%c0_28, %c24] : memref<8x32xf32, #tpu.memory_space<vmem>>, vector<8x8xf32>
    tpu.vector_store %arg22[%c0_28, %c24], %80 {strides = array<i32>} : memref<8x32xf32, #tpu.memory_space<vmem>>, vector<8x8xf32>,
    %c0_29 = arith.constant 0 : index
    %c0_30 = arith.constant 0 : index
    %82 = vector.load %arg22[%c0_29, %c0_30] : memref<8x32xf32, #tpu.memory_space<vmem>>, vector<8x32xf32>
    %83 = arith.truncf %82 : vector<8x32xf32> to vector<8x32xbf16>
    %c0_31 = arith.constant 0 : index
    %c0_32 = arith.constant 0 : index
    %84 = vector.load %arg10[%c0_31, %c0_32] : memref<32x32xbf16, #tpu.memory_space<vmem>>, vector<32x32xbf16>
    %cst_33 = arith.constant dense<0.000000e+00> : vector<8x32xf32>
    %85 = tpu.matmul %83, %84, %cst_33 {dimension_numbers = #tpu.dot_dimension_numbers<[1], [0], [0], [1], [0, 0, 1, 1], [], []>} : vector<8x32xbf16>, vector<32x32xbf16>, vector<8x32xf32> -> vector<8x32xf32>
    %c0_34 = arith.constant 0 : index
    %c0_35 = arith.constant 0 : index
    %86 = vector.load %arg11[%c0_34, %c0_35] : memref<1x32xf32, #tpu.memory_space<vmem>>, vector<1x32xf32>
    %87 = vector.broadcast %86 : vector<1x32xf32> to vector<8x32xf32>
    %88 = arith.addf %85, %87 : vector<8x32xf32>
    %89 = arith.addf %88, %3 : vector<8x32xf32>
    %cst_36 = arith.constant dense<0.000000e+00> : vector<8xf32>
    %90 = vector.multi_reduction <add>, %89, %cst_36 [1] : vector<8x32xf32> to vector<8xf32>
    %91 = vector.shape_cast %90 : vector<8xf32> to vector<8x1xf32>
    %cst_37 = arith.constant 3.200000e+01 : f32
    %92 = vector.broadcast %cst_37 : f32 to vector<8x1xf32>
    %93 = arith.divf %91, %92 : vector<8x1xf32>
    %94 = arith.mulf %89, %89 : vector<8x32xf32>
    %cst_38 = arith.constant dense<0.000000e+00> : vector<8xf32>
    %95 = vector.multi_reduction <add>, %94, %cst_38 [1] : vector<8x32xf32> to vector<8xf32>
    %96 = vector.shape_cast %95 : vector<8xf32> to vector<8x1xf32>
    %cst_39 = arith.constant 3.200000e+01 : f32
    %97 = vector.broadcast %cst_39 : f32 to vector<8x1xf32>
    %98 = arith.divf %96, %97 : vector<8x1xf32>
    %99 = arith.mulf %93, %93 : vector<8x1xf32>
    %100 = arith.subf %98, %99 : vector<8x1xf32>
    %cst_40 = arith.constant 9.99999996E-13 : f32
    %101 = vector.broadcast %cst_40 : f32 to vector<8x1xf32>
    %102 = arith.addf %100, %101 : vector<8x1xf32>
    %103 = math.rsqrt %102 : vector<8x1xf32>
    %c0_41 = arith.constant 0 : index
    %c0_42 = arith.constant 0 : index
    %104 = vector.load %arg12[%c0_41, %c0_42] : memref<1x32xf32, #tpu.memory_space<vmem>>, vector<1x32xf32>
    %105 = vector.broadcast %93 : vector<8x1xf32> to vector<8x32xf32>
    %106 = arith.subf %89, %105 : vector<8x32xf32>
    %107 = vector.broadcast %103 : vector<8x1xf32> to vector<8x32xf32>
    %108 = arith.mulf %106, %107 : vector<8x32xf32>
    %109 = vector.broadcast %104 : vector<1x32xf32> to vector<8x32xf32>
    %110 = arith.mulf %109, %108 : vector<8x32xf32>
    %c0_43 = arith.constant 0 : index
    %c0_44 = arith.constant 0 : index
    %111 = vector.load %arg13[%c0_43, %c0_44] : memref<1x32xf32, #tpu.memory_space<vmem>>, vector<1x32xf32>
    %112 = vector.broadcast %111 : vector<1x32xf32> to vector<8x32xf32>
    %113 = arith.addf %110, %112 : vector<8x32xf32>
    %114 = arith.truncf %113 : vector<8x32xf32> to vector<8x32xbf16>
    %c0_45 = arith.constant 0 : index
    %c0_46 = arith.constant 0 : index
    %115 = vector.load %arg14[%c0_45, %c0_46] : memref<32x64xbf16, #tpu.memory_space<vmem>>, vector<32x64xbf16>
    %cst_47 = arith.constant dense<0.000000e+00> : vector<8x64xf32>
    %116 = tpu.matmul %114, %115, %cst_47 {dimension_numbers = #tpu.dot_dimension_numbers<[1], [0], [0], [1], [0, 0, 1, 1], [], []>} : vector<8x32xbf16>, vector<32x64xbf16>, vector<8x64xf32> -> vector<8x64xf32>
    %c0_48 = arith.constant 0 : index
    %c0_49 = arith.constant 0 : index
    %117 = vector.load %arg15[%c0_48, %c0_49] : memref<1x64xf32, #tpu.memory_space<vmem>>, vector<1x64xf32>
    %118 = vector.broadcast %117 : vector<1x64xf32> to vector<8x64xf32>
    %119 = arith.addf %116, %118 : vector<8x64xf32>
    %cst_50 = arith.constant 5.000000e-01 : f32
    %120 = vector.broadcast %cst_50 : f32 to vector<8x64xf32>
    %121 = arith.mulf %119, %120 : vector<8x64xf32>
    %cst_51 = arith.constant 0.707106769 : f32
    %122 = vector.broadcast %cst_51 : f32 to vector<8x64xf32>
    %123 = arith.mulf %119, %122 : vector<8x64xf32>
    %124 = math.erf %123 : vector<8x64xf32>
    %cst_52 = arith.constant 1.000000e+00 : f32
    %125 = vector.broadcast %cst_52 : f32 to vector<8x64xf32>
    %126 = arith.addf %125, %124 : vector<8x64xf32>
    %127 = arith.mulf %121, %126 : vector<8x64xf32>
    %128 = arith.truncf %127 : vector<8x64xf32> to vector<8x64xbf16>
    %c0_53 = arith.constant 0 : index
    %c0_54 = arith.constant 0 : index
    %129 = vector.load %arg16[%c0_53, %c0_54] : memref<64x32xbf16, #tpu.memory_space<vmem>>, vector<64x32xbf16>
    %cst_55 = arith.constant dense<0.000000e+00> : vector<8x32xf32>
    %130 = tpu.matmul %128, %129, %cst_55 {dimension_numbers = #tpu.dot_dimension_numbers<[1], [0], [0], [1], [0, 0, 1, 1], [], []>} : vector<8x64xbf16>, vector<64x32xbf16>, vector<8x32xf32> -> vector<8x32xf32>
    %c0_56 = arith.constant 0 : index
    %c0_57 = arith.constant 0 : index
    %131 = vector.load %arg17[%c0_56, %c0_57] : memref<1x32xf32, #tpu.memory_space<vmem>>, vector<1x32xf32>
    %132 = vector.broadcast %131 : vector<1x32xf32> to vector<8x32xf32>
    %133 = arith.addf %130, %132 : vector<8x32xf32>
    %134 = arith.addf %133, %113 : vector<8x32xf32>
    %cst_58 = arith.constant dense<0.000000e+00> : vector<8xf32>
    %135 = vector.multi_reduction <add>, %134, %cst_58 [1] : vector<8x32xf32> to vector<8xf32>
    %136 = vector.shape_cast %135 : vector<8xf32> to vector<8x1xf32>
    %cst_59 = arith.constant 3.200000e+01 : f32
    %137 = vector.broadcast %cst_59 : f32 to vector<8x1xf32>
    %138 = arith.divf %136, %137 : vector<8x1xf32>
    %139 = arith.mulf %134, %134 : vector<8x32xf32>
    %cst_60 = arith.constant dense<0.000000e+00> : vector<8xf32>
    %140 = vector.multi_reduction <add>, %139, %cst_60 [1] : vector<8x32xf32> to vector<8xf32>
    %141 = vector.shape_cast %140 : vector<8xf32> to vector<8x1xf32>
    %cst_61 = arith.constant 3.200000e+01 : f32
    %142 = vector.broadcast %cst_61 : f32 to vector<8x1xf32>
    %143 = arith.divf %141, %142 : vector<8x1xf32>
    %144 = arith.mulf %138, %138 : vector<8x1xf32>
    %145 = arith.subf %143, %144 : vector<8x1xf32>
    %cst_62 = arith.constant 9.99999996E-13 : f32
    %146 = vector.broadcast %cst_62 : f32 to vector<8x1xf32>
    %147 = arith.addf %145, %146 : vector<8x1xf32>
    %148 = math.rsqrt %147 : vector<8x1xf32>
    %c0_63 = arith.constant 0 : index
    %c0_64 = arith.constant 0 : index
    %149 = vector.load %arg18[%c0_63, %c0_64] : memref<1x32xf32, #tpu.memory_space<vmem>>, vector<1x32xf32>
    %150 = vector.broadcast %138 : vector<8x1xf32> to vector<8x32xf32>
    %151 = arith.subf %134, %150 : vector<8x32xf32>
    %152 = vector.broadcast %148 : vector<8x1xf32> to vector<8x32xf32>
    %153 = arith.mulf %151, %152 : vector<8x32xf32>
    %154 = vector.broadcast %149 : vector<1x32xf32> to vector<8x32xf32>
    %155 = arith.mulf %154, %153 : vector<8x32xf32>
    %c0_65 = arith.constant 0 : index
    %c0_66 = arith.constant 0 : index
    %156 = vector.load %arg19[%c0_65, %c0_66] : memref<1x32xf32, #tpu.memory_space<vmem>>, vector<1x32xf32>
    %157 = vector.broadcast %156 : vector<1x32xf32> to vector<8x32xf32>
    %158 = arith.addf %155, %157 : vector<8x32xf32>
    %c0_67 = arith.constant 0 : index
    %c0_68 = arith.constant 0 : index
    %159 = vector.load %arg21[%c0_67, %c0_68] : memref<8x32xf32, #tpu.memory_space<vmem>>, vector<8x32xf32>
    tpu.vector_store %arg21[%c0_67, %c0_68], %158 {strides = array<i32>} : memref<8x32xf32, #tpu.memory_space<vmem>>, vector<8x32xf32>,
    %c0_69 = arith.constant 0 : index
    %c0_70 = arith.constant 0 : index
    %c0_71 = arith.constant 0 : index
    %c0_72 = arith.constant 0 : index
    %160 = vector.load %arg20[%c0_69, %c0_70, %c0_71, %c0_72] : memref<1x1x8x32xf32, #tpu.memory_space<vmem>>, vector<1x1x8x32xf32>
    %161 = vector.shape_cast %160 : vector<1x1x8x32xf32> to vector<8x32xf32>
    %162 = vector.shape_cast %158 : vector<8x32xf32> to vector<1x1x8x32xf32>
    tpu.vector_store %arg20[%c0_69, %c0_70, %c0_71, %c0_72], %162 {strides = array<i32>} : memref<1x1x8x32xf32, #tpu.memory_space<vmem>>, vector<1x1x8x32xf32>,
    return
  }
  func.func @transform_0(%arg0: i32, %arg1: i32) -> (i32, i32, i32) {
    %c0_i32 = arith.constant 0 : i32
    %c0_i32_0 = arith.constant 0 : i32
    %c0_i32_1 = arith.constant 0 : i32
    return %arg0, %c0_i32, %c0_i32_0 : i32, i32, i32
  }
  func.func @transform_1(%arg0: i32, %arg1: i32) -> (i32, i32, i32) {
    %c0_i32 = arith.constant 0 : i32
    %c0_i32_0 = arith.constant 0 : i32
    %c0_i32_1 = arith.constant 0 : i32
    return %arg0, %c0_i32, %c0_i32_0 : i32, i32, i32
  }
  func.func @transform_2(%arg0: i32, %arg1: i32) -> (i32, i32) {
    %c0_i32 = arith.constant 0 : i32
    %c0_i32_0 = arith.constant 0 : i32
    %c0_i32_1 = arith.constant 0 : i32
    return %c0_i32, %c0_i32_0 : i32, i32
  }
  func.func @transform_3(%arg0: i32, %arg1: i32) -> (i32, i32) {
    %c0_i32 = arith.constant 0 : i32
    %c0_i32_0 = arith.constant 0 : i32
    %c0_i32_1 = arith.constant 0 : i32
    return %c0_i32, %c0_i32_0 : i32, i32
  }
  func.func @transform_4(%arg0: i32, %arg1: i32) -> (i32, i32) {
    %c0_i32 = arith.constant 0 : i32
    %c0_i32_0 = arith.constant 0 : i32
    %c0_i32_1 = arith.constant 0 : i32
    return %c0_i32, %c0_i32_0 : i32, i32
  }
  func.func @transform_5(%arg0: i32, %arg1: i32) -> (i32, i32) {
    %c0_i32 = arith.constant 0 : i32
    %c0_i32_0 = arith.constant 0 : i32
    %c0_i32_1 = arith.constant 0 : i32
    return %c0_i32, %c0_i32_0 : i32, i32
  }
  func.func @transform_6(%arg0: i32, %arg1: i32) -> (i32, i32) {
    %c0_i32 = arith.constant 0 : i32
    %c0_i32_0 = arith.constant 0 : i32
    %c0_i32_1 = arith.constant 0 : i32
    return %c0_i32, %c0_i32_0 : i32, i32
  }
  func.func @transform_7(%arg0: i32, %arg1: i32) -> (i32, i32) {
    %c0_i32 = arith.constant 0 : i32
    %c0_i32_0 = arith.constant 0 : i32
    %c0_i32_1 = arith.constant 0 : i32
    return %c0_i32, %c0_i32_0 : i32, i32
  }
  func.func @transform_8(%arg0: i32, %arg1: i32) -> (i32, i32) {
    %c0_i32 = arith.constant 0 : i32
    %c0_i32_0 = arith.constant 0 : i32
    %c0_i32_1 = arith.constant 0 : i32
    return %c0_i32, %c0_i32_0 : i32, i32
  }
  func.func @transform_9(%arg0: i32, %arg1: i32) -> (i32, i32) {
    %c0_i32 = arith.constant 0 : i32
    %c0_i32_0 = arith.constant 0 : i32
    %c0_i32_1 = arith.constant 0 : i32
    return %c0_i32, %c0_i32_0 : i32, i32
  }
  func.func @transform_10(%arg0: i32, %arg1: i32) -> (i32, i32) {
    %c0_i32 = arith.constant 0 : i32
    %c0_i32_0 = arith.constant 0 : i32
    %c0_i32_1 = arith.constant 0 : i32
    return %c0_i32, %c0_i32_0 : i32, i32
  }
  func.func @transform_11(%arg0: i32, %arg1: i32) -> (i32, i32) {
    %c0_i32 = arith.constant 0 : i32
    %c0_i32_0 = arith.constant 0 : i32
    %c0_i32_1 = arith.constant 0 : i32
    return %c0_i32, %c0_i32_0 : i32, i32
  }
  func.func @transform_12(%arg0: i32, %arg1: i32) -> (i32, i32) {
    %c0_i32 = arith.constant 0 : i32
    %c0_i32_0 = arith.constant 0 : i32
    %c0_i32_1 = arith.constant 0 : i32
    return %c0_i32, %c0_i32_0 : i32, i32
  }
  func.func @transform_13(%arg0: i32, %arg1: i32) -> (i32, i32) {
    %c0_i32 = arith.constant 0 : i32
    %c0_i32_0 = arith.constant 0 : i32
    %c0_i32_1 = arith.constant 0 : i32
    return %c0_i32, %c0_i32_0 : i32, i32
  }
  func.func @transform_14(%arg0: i32, %arg1: i32) -> (i32, i32) {
    %c0_i32 = arith.constant 0 : i32
    %c0_i32_0 = arith.constant 0 : i32
    %c0_i32_1 = arith.constant 0 : i32
    return %c0_i32, %c0_i32_0 : i32, i32
  }
  func.func @transform_15(%arg0: i32, %arg1: i32) -> (i32, i32) {
    %c0_i32 = arith.constant 0 : i32
    %c0_i32_0 = arith.constant 0 : i32
    %c0_i32_1 = arith.constant 0 : i32
    return %c0_i32, %c0_i32_0 : i32, i32
  }
  func.func @transform_16(%arg0: i32, %arg1: i32) -> (i32, i32) {
    %c0_i32 = arith.constant 0 : i32
    %c0_i32_0 = arith.constant 0 : i32
    %c0_i32_1 = arith.constant 0 : i32
    return %c0_i32, %c0_i32_0 : i32, i32
  }
  func.func @transform_17(%arg0: i32, %arg1: i32) -> (i32, i32) {
    %c0_i32 = arith.constant 0 : i32
    %c0_i32_0 = arith.constant 0 : i32
    %c0_i32_1 = arith.constant 0 : i32
    return %c0_i32, %c0_i32_0 : i32, i32
  }
  func.func @transform_18(%arg0: i32, %arg1: i32) -> (i32, i32, i32, i32) {
    %c0_i32 = arith.constant 0 : i32
    %c0_i32_0 = arith.constant 0 : i32
    %c0_i32_1 = arith.constant 0 : i32
    return %arg1, %arg0, %c0_i32, %c0_i32_0 : i32, i32, i32, i32
  }
}

</mosaic_0001>

<bundles_post_ra>
// kernel: tpu_custom_call.1
= control target key start
LH: loop header
LB: loop body
LE: loop exit
PB: predicated region body
PF: predicated region fallthrough
CT: control target
= control target key end

     0   :  { %s3056_s0 = inlined_call_operand.vmem [shape: f32[2,8,32], index: 0, kind: input, shape index: {}]   ;;  %s3057_s1 = inlined_call_operand.vmem [shape: f32[2,1,8], index: 1, kind: input, shape index: {}]   ;;  %s3058_s2 = inlined_call_operand.vmem [shape: bf16[32,32], index: 2, kind: input, shape index: {}]   ;;  %s3059_s3 = inlined_call_operand.hbm [shape: f32[1,32], index: 3, kind: input, shape index: {}]   ;;  %s3060_s4 = inlined_call_operand.vmem [shape: bf16[32,32], index: 4, kind: input, shape index: {}]   ;;  %s3061_s5 = inlined_call_operand.hbm [shape: f32[1,32], index: 5, kind: input, shape index: {}]   ;;  %s3062_s6 = inlined_call_operand.hbm [shape: bf16[32,32], index: 6, kind: input, shape index: {}]   ;;  %s3063_s7 = inlined_call_operand.hbm [shape: f32[1,32], index: 7, kind: input, shape index: {}]   ;;  %s3064_s8 = inlined_call_operand.hbm [shape: bf16[32,32], index: 8, kind: input, shape index: {}]   ;;  %s3065_s9 = inlined_call_operand.hbm [shape: f32[1,32], index: 9, kind: input, shape index: {}]   ;;  %s3066_s10 = inlined_call_operand.vmem [shape: f32[1,32], index: 10, kind: input, shape index: {}]   ;;  %s3067_s11 = inlined_call_operand.vmem [shape: f32[1,32], index: 11, kind: input, shape index: {}]   ;;  %s3068_s12 = inlined_call_operand.vmem [shape: bf16[32,64], index: 12, kind: input, shape index: {}]   ;;  %s3069_s13 = inlined_call_operand.vmem [shape: f32[1,64], index: 13, kind: input, shape index: {}]   ;;  %s3070_s14 = inlined_call_operand.vmem [shape: bf16[64,32], index: 14, kind: input, shape index: {}]   ;;  %s3071_s15 = inlined_call_operand.vmem [shape: f32[1,32], index: 15, kind: input, shape index: {}]   ;;  %s3072_s16 = inlined_call_operand.vmem [shape: f32[1,32], index: 16, kind: input, shape index: {}]   ;;  %s3073_s17 = inlined_call_operand.vmem [shape: f32[1,32], index: 17, kind: input, shape index: {}]   ;;  %s3074_s18 = inlined_call_operand.hbm [shape: f32[2,2,8,32], index: 18, kind: output, shape index: {}]  }
   0x1   :  { %3092 = sst [smem:[#allocation31_spill]] %s3056_s0 }
   0x2   :  { %3093 = sst [smem:[#allocation32_spill]] %s3057_s1 }
   0x3   :  { %3094 = sst [smem:[#allocation33_spill]] %s3058_s2 }
   0x4   :  { %3095 = sst [smem:[#allocation34_spill]] %s3059_s3 }
   0x5   :  { %3096 = sst [smem:[#allocation35_spill]] %s3061_s5 }
   0x6   :  { %3097 = sst [smem:[#allocation36_spill]] %s3063_s7 }
   0x7   :  { %3098 = sst [smem:[#allocation37_spill]] %s3069_s13 }
   0x8   :  { %3099 = sst [smem:[#allocation38_spill]] %s3071_s15 }
   0x9   :  { %3100 = sst [smem:[#allocation39_spill]] %s3072_s16 }
   0xa   :  { %3101 = sst [smem:[#allocation40_spill]] %s3073_s17 }
   0xb   :  { %3102 = sst [smem:[#allocation41_spill]] %s3074_s18 }
   0xc   :  { %23 = vsyncpa [#allocation5], 0 }
   0xd   :  { %24 = vsyncpa [#allocation8], 0 }
   0xe   :  { %25 = vsyncpa [#allocation11], 0 }
   0xf   :  { %26 = vsyncpa [#allocation14], 0 }
  0x10   :  { %27 = vsyncpa [#allocation6], 0 }
  0x11   :  { %29 = vsyncpa [#allocation6 + $0x1], 0  ;;  %s2594_s27 = smov 0   ;;  %s2596_s28 = smov 0  }
  0x12   :  { %s2598_s29 = smov 0   ;;  %s2600_s30 = smov 0  }
  0x13   :  { %s2602_s0 = smov 0   ;;  %s2604_s19 = smov 0  }
  0x14   :  { %s2606_s1 = smov 0   ;;  %s2608_s20 = smov 0  }
  0x15 LB: > { %3103 = sst [smem:[#allocation21_spill]] %s2452_s27  ;;  %s1824_s21 = sadd.s32 4294967295, %s2480_s20   ;;  %s2480_s20 = sphi %s2608_s20, %s35_s20   ;;  %s2476_s1 = sphi %s2606_s1, %s3144_s1   ;;  %s2472_s19 = sphi %s2604_s19, %s3143_s19   ;;  %s2468_s0 = sphi %s2602_s0, %s3142_s0   ;;  %s2464_s30 = sphi %s2600_s30, %s3147_s30   ;;  %s2460_s29 = sphi %s2598_s29, %s3140_s29   ;;  %s2456_s28 = sphi %s2596_s28, %s3146_s28   ;;  %s2452_s27 = sphi %s2594_s27, %s3145_s27  }
  0x16   : > { %3104 = sst [smem:[#allocation22_spill]] %s2460_s29  ;;  %s1825_s22 = sadd.s32 4294967294, %s2480_s20  }
  0x17   : > { %3105 = sst [smem:[#allocation23_spill]] %s2472_s19  ;;  %s44_s2 = sadd.s32 1, %s2472_s19 }
  0x18   : > { %3106 = sst [smem:[#allocation24_spill]] %s2476_s1  ;;  %s47_s23 = sadd.s32 1, %s2476_s1 }
  0x19   : > { %3107 = sst [smem:[#allocation25_spill]] %s2480_s20  ;;  %p45_p0 = scmp.ge.s32.totalorder %s44_s2, 2 }
  0x1a   : > { %s444_s24 = sadd.s32 1, %s2460_s29  ;;  %p454_p1 = scmp.ne.s32.totalorder %s2460_s29, %s2456_s28 }
  0x1b   : > { %p455_p2 = scmp.eq.s32.totalorder %s1824_s21, 3  ;;  %s3149_s2 = smov (%p45_p0, %s44_s2), 0 }
  0x1c   : > { %3108 = sst [smem:[#allocation26_spill]] %s3149_s2  ;;  %s3151_s23 = smov (!%p45_p0, %s47_s23), %s2476_s1 }
  0x1d   : > { %s439_s25 = ssub.s32 %s2472_s19, %s3149_s2  ;;  %p2646_p3 = por %p455_p2, %p454_p1 }
  0x1e   : > { %p49_p4 = scmp.ge.s32.totalorder %s3151_s23, 2  ;;  %p460_p5 = scmp.ne.s32.totalorder %s2456_s28, %s2452_s27 }
  0x1f   : > { %s3109_s26 = scalar_select %p2646_p3, 1, 0 }
  0x20   : > { %p461_p6 = scmp.eq.s32.totalorder %s1825_s22, 3  ;;  %p1826_p7 = scmp.ge.s32.totalorder %s2480_s20, 1 }
  0x21   : > { %3110 = sst [smem:[#allocation27_spill]] %s3109_s26  ;;  %s3153_s23 = smov (%p49_p4, %s3151_s23), 0 }
  0x22   : > { %3111 = sst [smem:[#allocation28_spill]] %s3153_s23  ;;  %p2655_p8 = por %p461_p6, %p460_p5 }
  0x23   : > { %p468_p9 = scmp.lt.s32.totalorder %s2480_s20, 5  ;;  %s440_s17 = ssub.s32 %s2476_s1, %s3153_s23 }
  0x24   : > { %s3112_s18 = scalar_select %p2655_p8, 1, 0 }
  0x25   : > { %s441_s16 = sor.u32 %s440_s17, %s439_s25  ;;  %p2662_p10 = pnand %p1826_p7, %p468_p9 }
  0x26   : > { %3113 = sst [smem:[#allocation29_spill]] %s3112_s18  ;;  %p442_p11 = scmp.eq.s32.totalorder %s441_s16, 0 }
  0x27   : > { %s3114_s2 = scalar_select %p2662_p10, 1, 0 }
  0x28   : > { %p2666_p12 = scmp.eq.s32.totalorder %s1824_s21, 0  ;;  %p2050_p13 = pneg %p2662_p10 }
  0x29   : > { %s2673_s22 = scalar_select %p442_p11, %s2460_s29, %s444_s24  }
  0x2a   : > { %s3115_s19 = scalar_select %p2666_p12, 1, 0 }
  0x2b   : > { %3116 = sst [smem:[#allocation30_spill]] %s2673_s22  ;;  %p2677_p0 = pnand %p2666_p12, %p2050_p13 }
  0x2c   : > { %s2482_s17 = smov [#allocation7]   ;;  %s2483_s23 = smov [#allocation10]  }
  0x2d   : > { %s498_s25 = sshll.u32 %s2482_s17, 4  ;;  %s522_s16 = sshll.u32 %s2483_s23, 4  ;;  %s499_s25 = int_to_ptr.vmem [resolvable:$true] %s498_s25  ;;  %s523_s16 = int_to_ptr.vmem [resolvable:$true] %s522_s16 }
  0x2e   : > { %s3118_s5 = sld [smem:[#allocation35_spill]]  ;;  %p2689_p2 = pneg %p2677_p0 }
  0x34   : > { %s2202_s27 = scalar_lea.hbm %s3118_s5, 16 }
  0x35   : > { %p2203_p1 = scmp.ne.s32.totalorder %s3118_s5, %s2202_s27  ;;  %p2209_p6 = scmp.lt.u32.totalorder %s2202_s27, %s3118_s5 }
  0x37   : > { %p2205_p4 = pnand %p2689_p2, %p2203_p1 }
  0x39   : > { %p2206_p5 = pneg %p2205_p4 }
  0x3b   : > { %p2211_p7 = pnand %p2209_p6, %p2206_p5 }
  0x3d   : > { %2214 = shalt.err (!%p2211_p7)
}
  0x3e   : > { %s2215_s1 = scalar_lea.vmem %s499_s25, 16  ;;  %s2222_s20 = scalar_lea.vmem %s499_s25, 32 }
  0x3f   : > { %p2216_p9 = scmp.ne.s32.totalorder %s499_s25, %s2215_s1  ;;  %p2223_p8 = scmp.lt.s32.totalorder %s499_s25, %s499_s25 }
  0x40   : > { %p2224_p3 = scmp.lt.s32.totalorder %s2222_s20, %s2215_s1 }
  0x41   : > { %p2218_p11 = pnand %p2216_p9, %p2689_p2 }
  0x42   : > { %p2225_p12 = por %p2224_p3, %p2223_p8 }
  0x43   : > { %p2219_p13 = pneg %p2218_p11 }
  0x45   : > { %p2226_p10 = pnand %p2225_p12, %p2219_p13 }
  0x47   : > { %2229 = shalt.err (!%p2226_p10)
}
  0x48   : > { %2056 = dma.hbm_to_vmem [thread:$0]  (!%p2677_p0), %s3118_s5, 16, %s499_s25, [#allocation8]  }
  0x49   : > { %s3120_s7 = sld [smem:[#allocation36_spill]] }
  0x4f   : > { %s2230_s21 = scalar_lea.hbm %s3120_s7, 16 }
  0x50   : > { %p2231_p1 = scmp.ne.s32.totalorder %s3120_s7, %s2230_s21  ;;  %p2237_p10 = scmp.lt.u32.totalorder %s2230_s21, %s3120_s7 }
  0x52   : > { %p2233_p3 = pnand %p2231_p1, %p2689_p2 }
  0x54   : > { %p2234_p8 = pneg %p2233_p3 }
  0x56   : > { %p2239_p12 = pnand %p2237_p10, %p2234_p8 }
  0x58   : > { %2242 = shalt.err (!%p2239_p12)
}
  0x59   : > { %s2243_s23 = scalar_lea.vmem %s523_s16, 16  ;;  %s2250_s25 = scalar_lea.vmem %s523_s16, 32 }
  0x5a   : > { %p2244_p4 = scmp.ne.s32.totalorder %s523_s16, %s2243_s23  ;;  %p2251_p7 = scmp.lt.s32.totalorder %s523_s16, %s523_s16 }
  0x5b   : > { %p2252_p9 = scmp.lt.s32.totalorder %s2250_s25, %s2243_s23 }
  0x5c   : > { %p2246_p5 = pnand %p2244_p4, %p2689_p2 }
  0x5d   : > { %p2253_p11 = por %p2252_p9, %p2251_p7 }
  0x5e   : > { %p2247_p6 = pneg %p2246_p5 }
  0x60   : > { %p2254_p13 = pnand %p2253_p11, %p2247_p6 }
  0x62   : > { %2257 = shalt.err (!%p2254_p13)
}
  0x63   : > { %2062 = dma.hbm_to_vmem [thread:$0]  (!%p2677_p0), %s3120_s7, 16, %s523_s16, [#allocation11]  }
  0x64   : > { %s2484_s27 = smov [#allocation4]   ;;  %s2485_s21 = smov [#allocation9]  }
  0x65   : > { %s484_s22 = sshll.u32 %s2484_s27, 4  ;;  %s508_s17 = sshll.u32 %s2485_s21, 4  ;;  %s485_s22 = int_to_ptr.vmem [resolvable:$true] %s484_s22  ;;  %s509_s17 = int_to_ptr.vmem [resolvable:$true] %s508_s17 }
  0x66   : > { %s3121_s3 = sld [smem:[#allocation34_spill]] }
  0x6c   : > { %s2258_s5 = scalar_lea.hbm %s3121_s3, 16 }
  0x6d   : > { %p2259_p1 = scmp.ne.s32.totalorder %s3121_s3, %s2258_s5  ;;  %p2265_p10 = scmp.lt.u32.totalorder %s2258_s5, %s3121_s3 }
  0x6f   : > { %p2261_p3 = pnand %p2259_p1, %p2689_p2 }
  0x71   : > { %p2262_p8 = pneg %p2261_p3 }
  0x73   : > { %p2267_p12 = pnand %p2265_p10, %p2262_p8 }
  0x75   : > { %2270 = shalt.err (!%p2267_p12)
}
  0x76   : > { %s2271_s16 = scalar_lea.vmem %s485_s22, 16  ;;  %s2278_s26 = scalar_lea.vmem %s485_s22, 32 }
  0x77   : > { %p2272_p4 = scmp.ne.s32.totalorder %s485_s22, %s2271_s16  ;;  %p2279_p7 = scmp.lt.s32.totalorder %s485_s22, %s485_s22 }
  0x78   : > { %p2280_p9 = scmp.lt.s32.totalorder %s2278_s26, %s2271_s16 }
  0x79   : > { %p2274_p5 = pnand %p2272_p4, %p2689_p2 }
  0x7a   : > { %p2281_p11 = por %p2280_p9, %p2279_p7 }
  0x7b   : > { %p2275_p6 = pneg %p2274_p5 }
  0x7d   : > { %p2282_p13 = pnand %p2281_p11, %p2275_p6 }
  0x7f   : > { %2285 = shalt.err (!%p2282_p13)
}
  0x80   : > { %2053 = dma.hbm_to_vmem [thread:$0]  (!%p2677_p0), %s3121_s3, 16, %s485_s22, [#allocation5]  }
  0x81   : > { %s2286_s1 = scalar_lea.hbm %s3062_s6, 256 }
  0x82   : > { %p2287_p1 = scmp.ne.s32.totalorder %s3062_s6, %s2286_s1  ;;  %p2293_p10 = scmp.lt.u32.totalorder %s2286_s1, %s3062_s6 }
  0x84   : > { %p2289_p3 = pnand %p2287_p1, %p2689_p2 }
  0x86   : > { %p2290_p8 = pneg %p2289_p3 }
  0x88   : > { %p2295_p12 = pnand %p2293_p10, %p2290_p8 }
  0x8a   : > { %2298 = shalt.err (!%p2295_p12)
}
  0x8b   : > { %s2299_s16 = scalar_lea.vmem %s509_s17, 256  ;;  %p2307_p7 = scmp.lt.s32.totalorder %s509_s17, %s509_s17 }
  0x8c   : > { %p2300_p4 = scmp.ne.s32.totalorder %s509_s17, %s2299_s16  ;;  %p2308_p9 = scmp.lt.s32.totalorder %s2299_s16, %s2299_s16 }
  0x8e   : > { %p2302_p5 = pnand %p2300_p4, %p2689_p2  ;;  %p2309_p11 = por %p2308_p9, %p2307_p7 }
  0x90   : > { %p2303_p6 = pneg %p2302_p5 }
  0x92   : > { %p2310_p13 = pnand %p2309_p11, %p2303_p6 }
  0x94   : > { %2313 = shalt.err (!%p2310_p13)
}
  0x95   : > { %s2486_s22 = smov 64   ;;  %s2487_s26 = smov 4  }
  0x96   : > { %2059 = dma.hbm_to_vmem [thread:$0]  (!%p2677_p0), %s3062_s6, 256, %s509_s17, [#allocation8], %s2486_s22, %s2486_s22, %s2487_s26  }
  0x97   : > { %s2488_s5 = smov [#allocation12]   ;;  %s2489_s1 = smov [#allocation13]  }
  0x98   : > { %s532_s15 = sshll.u32 %s2488_s5, 4  ;;  %s546_s20 = sshll.u32 %s2489_s1, 4  ;;  %s533_s15 = int_to_ptr.vmem [resolvable:$true] %s532_s15  ;;  %s547_s20 = int_to_ptr.vmem [resolvable:$true] %s546_s20 }
  0x99   : > { %s2314_s29 = scalar_lea.hbm %s3064_s8, 256 }
  0x9a   : > { %p2315_p1 = scmp.ne.s32.totalorder %s3064_s8, %s2314_s29  ;;  %p2321_p10 = scmp.lt.u32.totalorder %s2314_s29, %s3064_s8 }
  0x9c   : > { %p2317_p3 = pnand %p2315_p1, %p2689_p2 }
  0x9e   : > { %p2318_p8 = pneg %p2317_p3 }
  0xa0   : > { %p2323_p12 = pnand %p2321_p10, %p2318_p8 }
  0xa2   : > { %2326 = shalt.err (!%p2323_p12)
}
  0xa3   : > { %s2327_s17 = scalar_lea.vmem %s533_s15, 256  ;;  %p2335_p7 = scmp.lt.s32.totalorder %s533_s15, %s533_s15 }
  0xa4   : > { %p2328_p4 = scmp.ne.s32.totalorder %s533_s15, %s2327_s17  ;;  %p2336_p9 = scmp.lt.s32.totalorder %s2327_s17, %s2327_s17 }
  0xa6   : > { %p2330_p5 = pnand %p2328_p4, %p2689_p2  ;;  %p2337_p11 = por %p2336_p9, %p2335_p7 }
  0xa8   : > { %p2331_p6 = pneg %p2330_p5 }
  0xaa   : > { %p2338_p13 = pnand %p2337_p11, %p2331_p6 }
  0xac   : > { %2341 = shalt.err (!%p2338_p13)
}
  0xad   : > { %2065 = dma.hbm_to_vmem [thread:$0]  (!%p2677_p0), %s3064_s8, 256, %s533_s15, [#allocation11], %s2486_s22, %s2486_s22, %s2487_s26  }
  0xae   : > { %s2342_s21 = scalar_lea.hbm %s3065_s9, 16 }
  0xaf   : > { %p2343_p1 = scmp.ne.s32.totalorder %s3065_s9, %s2342_s21  ;;  %p2349_p10 = scmp.lt.u32.totalorder %s2342_s21, %s3065_s9 }
  0xb1   : > { %p2345_p3 = pnand %p2343_p1, %p2689_p2 }
  0xb3   : > { %p2346_p8 = pneg %p2345_p3 }
  0xb5   : > { %p2351_p12 = pnand %p2349_p10, %p2346_p8 }
  0xb7   : > { %2354 = shalt.err (!%p2351_p12)
}
  0xb8   : > { %s2355_s29 = scalar_lea.vmem %s547_s20, 16  ;;  %s2362_s22 = scalar_lea.vmem %s547_s20, 32 }
  0xb9   : > { %p2356_p4 = scmp.ne.s32.totalorder %s547_s20, %s2355_s29  ;;  %p2363_p7 = scmp.lt.s32.totalorder %s547_s20, %s547_s20 }
  0xba   : > { %p2364_p9 = scmp.lt.s32.totalorder %s2362_s22, %s2355_s29 }
  0xbb   : > { %p2358_p5 = pnand %p2356_p4, %p2689_p2 }
  0xbc   : > { %p2365_p11 = por %p2364_p9, %p2363_p7 }
  0xbd   : > { %p2359_p6 = pneg %p2358_p5 }
  0xbf   : > { %p2366_p13 = pnand %p2365_p11, %p2359_p6 }
  0xc1   : > { %2369 = shalt.err (!%p2366_p13)
}
  0xc2   : > { %2068 = dma.hbm_to_vmem [thread:$0]  (!%p2677_p0), %s3065_s9, 16, %s547_s20, [#allocation14]  }
  0xc3   : > { %p3122_p1 = scmp.ne.s32.totalorder %s3114_s2, 0 }
  0xc4   : > { %p3123_p3 = scmp.ne.s32.totalorder (!%p3122_p1), %s3115_s19, 0 }
  0xc5   : > { %596 = sbr.rel (%p3122_p1) target bundleno = 2469 (0x9a5), region = 92 }
  0xcc   : > { %2431 = dma.done.wait (%p3123_p3), [#allocation5], 16  }
  0xcd   : > { %2433 = vsyncadd (%p3123_p3), [#allocation5], 4294967280 }
  0xce   : > { %2435 = dma.done.wait (%p3123_p3), [#allocation8], 272  }
  0xcf   : > { %2437 = vsyncadd (%p3123_p3), [#allocation8], 4294967024 }
  0xd0   : > { %2439 = dma.done.wait (%p3123_p3), [#allocation11], 272  }
  0xd1   : > { %2441 = vsyncadd (%p3123_p3), [#allocation11], 4294967024 }
  0xd2   : > { %2443 = dma.done.wait (%p3123_p3), [#allocation14], 16  }
  0xd3   : > { %2445 = vsyncadd (%p3123_p3), [#allocation14], 4294967280  ;;  %s669_s18 = sand.u32 1, %s2456_s28   ;;  %p672_p0 = scmp.lt.s32.totalorder %s2468_s0, 1 }
  0xd4   : > { %s2817_s2 = sshll.u32 %s669_s18, 3  ;;  %s3124_s3 = sld [smem:[#allocation32_spill]] }
  0xd5   : > { %s2820_s24 = scalar_select %p672_p0, %s2468_s0, 1 }
  0xd6   : > { %s3125_s13 = sld [smem:[#allocation31_spill]]  ;;  %s671_s5 = scalar_lea.vmem [#allocation15], %s2817_s2 }
  0xd7   : > { %s1842_s20 = sshll.u32 %s2820_s24, 3  ;;  %p1843_p2 = scmp.ne.s32.totalorder %s2464_s30, 0 }
  0xd8   : > { %vm685_vm0 = vcmask (!%p1843_p2), 261120  }
  0xd9   : > { %683 = sbr.rel (%p1843_p2) target bundleno = 224 (0xe0), region = 120 }
  0xda   : > { %s678_s19 = scalar_lea.vmem %s3124_s3, %s2820_s24 }
  0xdc   : > { %s675_s21 = scalar_lea.vmem %s3125_s13, %s1842_s20 }
  0xdd   : > { %v684_v0 = vld [vmem:[%s675_s21] sm:$0xff] (!%p1843_p2) }
  0xde   : > { %686 = vst.msk [vmem:[#allocation2] sm:$0xff] (!%p1843_p2), %vm685_vm0, %v684_v0 }
  0xe0 PF: > { %s3126_s25 = sld [smem:[#allocation33_spill]]  ;;  %v2490_v2 = vmov 0.0   ;;  %v2167_v3 = vld [vmem:[%s3060_s4] sm:$0xff]   ;;  %vm2491_vm1 = vmmov 0   ;;  %v2169_v5 = vld [vmem:[%s3060_s4 + $0x8] sm:$0xff]   ;;  %vm713_vm2 = vcmask 261120  }
  0xe1   : > { %1924 = vmatprep.subr.bf16.mxu0 %v2490_v2  ;;  %1932 = vmatprep.subr.bf16.mxu1 %v2490_v2  ;;  %v2170_v8 = vld [vmem:[#allocation9] sm:$0xff]   ;;  %v2171_v9 = vld [vmem:[#allocation9 + $0x8] sm:$0xff]   ;;  %v1844_v10 = vld [vmem:[#allocation4] ss:$0 sm:$0xff]  ;;  %s2492_s17 = smov 120   ;;  %vm925_vm3 = vcmask 64512  }
  0xe2   : > { %1928 = vmatprep.mubr.msk.bf16.mxu0 %vm2491_vm1, %v2490_v2  ;;  %1933 = vmatpush3.bf16.msra.mxu1 %v2167_v3  ;;  %v1848_v11 = vld [vmem:[#allocation7] ss:$0 sm:$0xff]  ;;  %s2493_s3 = smov 104   ;;  %s2494_s27 = smov 112   ;;  %v1852_v32 = vld [vmem:[#allocation10] ss:$0 sm:$0xff] }
  0xe3   : > { %1934 = vmatprep.subr.bf16.mxu1 %v2490_v2  ;;  %1936 = vmatprep.mubr.msk.bf16.mxu1 %vm2491_vm1, %v2490_v2  ;;  %vm1175_vm4 = vcmask 1043456   ;;  %v1860_v49 = vld [vmem:[%s678_s19] ss:$0 sm:$0xff]  ;;  %s2495_s24 = smov 8   ;;  %s2496_s19 = smov 16   ;;  %vm1362_vm5 = vcmask 130112  }
  0xe4   : > { %s2497_s1 = smov 24   ;;  %vm1368_vm6 = vcmask 195712   ;;  %vm1374_vm7 = vcmask 261312   ;;  %s3128_s22 = sld [smem:[#allocation37_spill]]  ;;  %vm1589_vm8 = vcmask 523264  }
  0xe5   : > { %v2852_v6 = vld [vmem:[#allocation2] sm:$0xff]  ;;  %s3129_s20 = sld [smem:[#allocation38_spill]]  ;;  %s1884_s16 = sshll.u32 %s2464_s30, 1 }
  0xe6   : > { %v2166_v1 = vld [vmem:[%s3126_s25] sm:$0xff]   ;;  %v2168_v4 = vld [vmem:[%s3126_s25 + $0x8] sm:$0xff]   ;;  %v689_v7 = vpack.c.bf16 %v2852_v6, %v2852_v6  ;;  %1935 = vmatpush3.bf16.msra.mxu1 %v2169_v5  ;;  %s3131_s13 = sld [smem:[#allocation39_spill]]  ;;  %s1683_s23 = sshll.u32 %s671_s5, 4  ;;  %s2999_s23 = int_to_ptr.vmem [resolvable:$true] %s1683_s23 }
  0xe7   : > { %1925 = vmatpush3.bf16.msra.mxu0 %v2166_v1  ;;  %1948 = vmatprep.subr.bf16.mxu1 %v2490_v2  ;;  %s1668_s26 = scalar_lea.sflag [#allocation6], %s669_s18  ;;  %s2370_s15 = scalar_lea.vmem %s2999_s23, 128 }
  0xe8   : > { %1926 = vmatprep.subr.bf16.mxu0 %v2490_v2  ;;  %p2371_p8 = scmp.ne.s32.totalorder %s2999_s23, %s2370_s15 }
  0xe9   : > { %1937 = vmatmul.mubr.msk.bf16.vlgmr.msra.gmra.mrb[0].mxu1 %vm713_vm2, %v689_v7 }
  0xea   : > { %1950 = vmatprep.mubr.msk.bf16.mxu1 %vm2491_vm1, %v2490_v2 }
  0xeb   : > { %1927 = vmatpush3.bf16.msra.mxu0 %v2168_v4 }
  0xec   : > { %1940 = vmatprep.subr.bf16.mxu0 %v2490_v2 }
  0xee   : > { %1929 = vmatmul.mubr.msk.bf16.vlgmr.msra.gmra.mrb[0].mxu0 %vm713_vm2, %v689_v7 }
  0xef   : > { %1944 = vmatprep.mubr.msk.bf16.mxu0 %vm2491_vm1, %v2490_v2  ;;  %1941 = vmatpush3.bf16.msra.mxu0 %v2170_v8 }
  0xf0   : > { %1942 = vmatprep.subr.bf16.mxu0 %v2490_v2 }
  0xf3   : > { %1943 = vmatpush3.bf16.msra.mxu0 %v2171_v9 }
  0xf4   : > { %1954 = vmatprep.subr.bf16.mxu0 %v2490_v2 }
  0xf6   : > { %1945 = vmatmul.mubr.msk.bf16.vlgmr.msra.gmra.mrb[4].mxu0 %vm713_vm2, %v689_v7 }
  0xf7   : > { %1956 = vmatprep.mubr.msk.bf16.mxu0 %vm2491_vm1, %v2490_v2 }
 0x1bc   : > { %v814_v14 = vpop.f32.mrb[0].mxu1 }
 0x1bd   : > { %v815_v16 = vadd.f32 %v1848_v11, %v814_v14  ;;  %v1938_v17 = vpop.f32.mrb[1].mxu1 }
 0x1be   : > { %v817_v19 = vpop.f32.mrb[2].mxu1 }
 0x1bf   : > { %898 = vrot.lane.b32.xlu0 %v815_v16, %s2492_s17  ;;  %v1939_v21 = vpop.f32.mrb[3].mxu1  ;;  %v907_v22 = vpack.c.bf16 %v815_v16, %v815_v16 }
 0x1c1   : > { %v751_v12 = vpop.f32.mrb[0].mxu0  ;;  %v930_v23 = vsel %vm925_vm3, %v907_v22, 0 }
 0x1c2   : > { %v752_v13 = vadd.f32 %v1844_v10, %v751_v12  ;;  %v1930_v15 = vpop.f32.mrb[1].mxu0  ;;  %1949 = vmatpush3.bf16.xpose.msra.mxu1 %v930_v23 }
 0x1c3   : > { %v754_v18 = vpop.f32.mrb[2].mxu0  ;;  %901 = vrot.lane.b32.xlu0 %v815_v16, %s2494_s27  ;;  %1960 = vmatprep.subr.bf16.mxu1 %v2490_v2 }
 0x1c4   : > { %884 = vrot.lane.b32.xlu1 %v752_v13, %s2492_s17  ;;  %v1931_v20 = vpop.f32.mrb[3].mxu0  ;;  %v893_v24 = vpack.c.bf16 %v752_v13, %v752_v13 }
 0x1c7   : > { %887 = vrot.lane.b32.xlu0 %v752_v13, %s2494_s27 }
 0x1c8   : > { %904 = vrot.lane.b32.xlu1 %v815_v16, %s2493_s3 }
 0x1c9   : > { %1951 = vmatmul.mubr.msk.bf16.vlgmr.msra.gmra.mrb[4].mxu1 %vm925_vm3, %v893_v24  ;;  %v877_v25 = vpop.f32.mrb[4].mxu0 }
 0x1ca   : > { %1962 = vmatprep.mubr.msk.bf16.mxu1 %vm2491_vm1, %v2490_v2  ;;  %v1946_v26 = vpop.f32.mrb[5].mxu0  ;;  %v2882_v37 = vadd.f32 %v1852_v32, %v877_v25 }
 0x1cb   : > { %v880_v27 = vpop.f32.mrb[6].mxu0 }
 0x1cc   : > { %890 = vrot.lane.b32.xlu1 %v752_v13, %s2493_s3  ;;  %v1947_v28 = vpop.f32.mrb[7].mxu0  ;;  %v921_v41 = vpack.c.bf16 %v2882_v37, %v2882_v37 }
 0x1ce   : > { %v1177_v45 = vsel %vm1175_vm4, %v921_v41, 0 }
 0x231   : > { %v899_v30 = vpop.permute.xlu0 %898 }
 0x232   : > { %v908_v31 = vpack.c.bf16 %v899_v30, %v899_v30 }
 0x234   : > { %v976_v33 = vsel %vm925_vm3, %v908_v31, 0 }
 0x235   : > { %v902_v34 = vpop.permute.xlu0 %901  ;;  %1955 = vmatpush3.bf16.xpose.msra.mxu0 %v976_v33 }
 0x236   : > { %v885_v29 = vpop.permute.xlu1 %884  ;;  %v909_v36 = vpack.c.bf16 %v902_v34, %v902_v34  ;;  %1966 = vmatprep.subr.bf16.mxu0 %v2490_v2 }
 0x237   : > { %v894_v40 = vpack.c.bf16 %v885_v29, %v885_v29 }
 0x238   : > { %v1022_v38 = vsel %vm925_vm3, %v909_v36, 0 }
 0x239   : > { %1961 = vmatpush3.bf16.xpose.msra.mxu1 %v1022_v38  ;;  %v888_v42 = vpop.permute.xlu0 %887 }
 0x23a   : > { %v905_v35 = vpop.permute.xlu1 %904  ;;  %1972 = vmatprep.subr.bf16.mxu1 %v2490_v2  ;;  %v895_v44 = vpack.c.bf16 %v888_v42, %v888_v42 }
 0x23b   : > { %v910_v39 = vpack.c.bf16 %v905_v35, %v905_v35 }
 0x23c   : > { %1957 = vmatmul.mubr.msk.bf16.vlgmr.msra.gmra.mrb[8].mxu0 %vm925_vm3, %v894_v40 }
 0x23d   : > { %v1068_v43 = vsel %vm925_vm3, %v910_v39, 0  ;;  %1968 = vmatprep.mubr.msk.bf16.mxu0 %vm2491_vm1, %v2490_v2 }
 0x23e   : > { %1967 = vmatpush3.bf16.xpose.msra.mxu0 %v1068_v43  ;;  %v891_v46 = vpop.permute.xlu1 %890 }
 0x23f   : > { %1978 = vmatprep.subr.bf16.mxu0 %v2490_v2  ;;  %v896_v47 = vpack.c.bf16 %v891_v46, %v891_v46 }
 0x240   : > { %1963 = vmatmul.mubr.msk.bf16.vlgmr.msra.gmra.mrb[8].mxu1 %vm925_vm3, %v895_v44 }
 0x241   : > { %1973 = vmatpush3.bf16.msra.mxu1 %v1177_v45  ;;  %1974 = vmatprep.mubr.msk.bf16.mxu1 %vm2491_vm1, %v2490_v2 }
 0x242   : > { %1984 = vmatprep.subr.bf16.mxu1 %v2490_v2 }
 0x245   : > { %1969 = vmatmul.mubr.msk.bf16.vlgmr.msra.gmra.mrb[12].mxu0 %vm925_vm3, %v896_v47 }
 0x246   : > { %1980 = vmatprep.mubr.msk.bf16.mxu0 %vm2491_vm1, %v2490_v2 }
 0x29c   : > { %v966_v48 = vpop.f32.mrb[4].mxu1 }
 0x29d   : > { %v1110_v50 = vmul.f32 0.35355338, %v966_v48  ;;  %v1952_v51 = vpop.f32.mrb[5].mxu1 }
 0x29e   : > { %v969_v52 = vpop.f32.mrb[6].mxu1 }
 0x29f   : > { %v1953_v53 = vpop.f32.mrb[7].mxu1  ;;  %v1120_v54 = vadd.f32 %v1860_v49, %v1110_v50 }
 0x2a1   : > { %v1124_v55 = vsel %vm925_vm3, %v1120_v54, -inf }
 0x2a2   : > { %1125 = vmax.xlane.f32.xlu0 %v1124_v55 }
 0x30f   : > { %v1012_v56 = vpop.f32.mrb[8].mxu0 }
 0x310   : > { %v1111_v57 = vmul.f32 0.35355338, %v1012_v56  ;;  %v1958_v58 = vpop.f32.mrb[9].mxu0 }
 0x311   : > { %v1015_v59 = vpop.f32.mrb[10].mxu0 }
 0x312   : > { %v1959_v60 = vpop.f32.mrb[11].mxu0  ;;  %v1121_v61 = vadd.f32 %v1860_v49, %v1111_v57 }
 0x313   : > { %v1058_v62 = vpop.f32.mrb[8].mxu1 }
 0x314   : > { %v1112_v63 = vmul.f32 0.35355338, %v1058_v62  ;;  %v1964_v0 = vpop.f32.mrb[9].mxu1  ;;  %v1127_v1 = vsel %vm925_vm3, %v1121_v61, -inf }
 0x315   : > { %v1061_v3 = vpop.f32.mrb[10].mxu1  ;;  %1128 = vmax.xlane.f32.xlu1 %v1127_v1  ;;  %v2172_v0 = vld [vmem:[#allocation12] sm:$0xff]   ;;  %v2173_v1 = vld [vmem:[#allocation12 + $0x8] sm:$0xff]  }
 0x316   : > { %v1965_v4 = vpop.f32.mrb[11].mxu1  ;;  %v1122_v5 = vadd.f32 %v1860_v49, %v1112_v63 }
 0x318   : > { %v1104_v7 = vpop.f32.mrb[12].mxu0  ;;  %v1130_v10 = vsel %vm925_vm3, %v1122_v5, -inf }
 0x319   : > { %v1113_v8 = vmul.f32 0.35355338, %v1104_v7  ;;  %v1970_v9 = vpop.f32.mrb[13].mxu0  ;;  %1131 = vmax.xlane.f32.xlu0 %v1130_v10 }
 0x31a   : > { %v1107_v11 = vpop.f32.mrb[14].mxu0 }
 0x31b   : > { %v1971_v12 = vpop.f32.mrb[15].mxu0  ;;  %v1123_v13 = vadd.f32 %v1860_v49, %v1113_v8 }
 0x31d   : > { %v1133_v14 = vsel %vm925_vm3, %v1123_v13, -inf }
 0x31e   : > { %1134 = vmax.xlane.f32.xlu0 %v1133_v14 }
 0x326   : > { %912 = vrot.lane.b32.xlu1 %v2882_v37, %s2492_s17  ;;  %s1679_s17 = sadd.s32 %s2468_s0, %s1884_s16 }
 0x32f   : > { %v1126_v15 = vpop.xlane.xlu0 %1125 }
 0x330   : > { %v1136_v16 = vsub.f32 %v1120_v54, %v1126_v15 }
 0x332   : > { %v1140_v17 = vmul.f32 1.442695, %v1136_v16 }
 0x334   : > { %2180 = vpow2.f32 %v1140_v17 }
 0x33e   : > { %v2181_v18 = vpop.eup %2180 }
 0x33f   : > { %v1148_v19 = vsel %vm925_vm3, %v2181_v18, 0.0 }
 0x34a   : > { %1149 = vadd.xlane.f32.xlu1 %v1148_v19 }
 0x3a2   : > { %v1129_v20 = vpop.xlane.xlu1 %1128 }
 0x3a3   : > { %v1137_v21 = vsub.f32 %v1121_v61, %v1129_v20 }
 0x3a5   : > { %v1142_v22 = vmul.f32 1.442695, %v1137_v21  ;;  %v1865_v21 = vld [vmem:[#allocation13] ss:$0 sm:$0xff] }
 0x3a6   : > { %v1132_v23 = vpop.xlane.xlu0 %1131  ;;  %v913_v24 = vpop.permute.xlu1 %912 }
 0x3a7   : > { %2182 = vpow2.f32 %v1142_v22  ;;  %v1138_v25 = vsub.f32 %v1122_v5, %v1132_v23  ;;  %v922_v26 = vpack.c.bf16 %v913_v24, %v913_v24 }
 0x3a9   : > { %v1144_v27 = vmul.f32 1.442695, %v1138_v25  ;;  %v1223_v28 = vsel %vm1175_vm4, %v922_v26, 0 }
 0x3aa   : > { %1979 = vmatpush3.bf16.msra.mxu0 %v1223_v28 }
 0x3ab   : > { %v1135_v29 = vpop.xlane.xlu0 %1134  ;;  %2184 = vpow2.f32 %v1144_v27  ;;  %1990 = vmatprep.subr.bf16.mxu0 %v2490_v2 }
 0x3ac   : > { %v1139_v30 = vsub.f32 %v1123_v13, %v1135_v29 }
 0x3ae   : > { %v1146_v31 = vmul.f32 1.442695, %v1139_v30 }
 0x3b0   : > { %2186 = vpow2.f32 %v1146_v31  ;;  %v2174_v31 = vld [vmem:[%s3068_s12] sm:$0xff]  }
 0x3b1   : > { %v2183_v32 = vpop.eup %2182 }
 0x3b2   : > { %v1151_v33 = vsel %vm925_vm3, %v2183_v32, 0.0 }
 0x3b3   : > { %1152 = vadd.xlane.f32.xlu0 %v1151_v33 }
 0x3b5   : > { %v2185_v34 = vpop.eup %2184 }
 0x3b6   : > { %v1154_v35 = vsel %vm925_vm3, %v2185_v34, 0.0 }
 0x3b7   : > { %1155 = vadd.xlane.f32.xlu1 %v1154_v35 }
 0x3ba   : > { %v2187_v36 = vpop.eup %2186 }
 0x3bb   : > { %v1157_v38 = vsel %vm925_vm3, %v2187_v36, 0.0 }
 0x3bc   : > { %1158 = vadd.xlane.f32.xlu0 %v1157_v38 }
 0x3c8   : > { %918 = vrot.lane.b32.xlu1 %v2882_v37, %s2493_s3  ;;  %s3130_s3 = sld [smem:[#allocation27_spill]] }
 0x3ce   : > { %p3134_p10 = scmp.ne.s32.totalorder %s3130_s3, 0 }
 0x3d0   : > { %p2372_p12 = pnand %p2371_p8, %p3134_p10 }
 0x3d2   : > { %915 = vrot.lane.b32.xlu0 %v2882_v37, %s2494_s27  ;;  %p2373_p4 = pneg %p2372_p12 }
 0x3d7   : > { %v1150_v39 = vpop.xlane.xlu1 %1149 }
 0x3d8   : > { %2188 = vrcp.f32 %v1150_v39 }
 0x3e2   : > { %v2189_v40 = vpop.eup %2188 }
 0x3e3   : > { %v1164_v41 = vmul.f32 %v2189_v40, %v2181_v18 }
 0x3e5   : > { %v1168_v42 = vpack.c.bf16 %v1164_v41, %v1164_v41 }
 0x3e7   : > { %1975 = vmatmul.mubr.msk.bf16.vlgmr.msra.gmra.mrb[12].mxu1 %vm925_vm3, %v1168_v42  ;;  %v1869_v42 = vld [vmem:[%s3066_s10] ss:$0 sm:$0xff] }
 0x3e8   : > { %1986 = vmatprep.mubr.msk.bf16.mxu1 %vm2491_vm1, %v2490_v2 }
 0x440   : > { %v1153_v43 = vpop.xlane.xlu0 %1152 }
 0x441   : > { %2190 = vrcp.f32 %v1153_v43 }
 0x444   : > { %v1156_v44 = vpop.xlane.xlu1 %1155 }
 0x445   : > { %2192 = vrcp.f32 %v1156_v44  ;;  %v1870_v44 = vld [vmem:[%s3067_s11] ss:$0 sm:$0xff] }
 0x448   : > { %v919_v46 = vpop.permute.xlu1 %918 }
 0x449   : > { %v1159_v45 = vpop.xlane.xlu0 %1158  ;;  %v924_v37 = vpack.c.bf16 %v919_v46, %v919_v46 }
 0x44a   : > { %2194 = vrcp.f32 %v1159_v45 }
 0x44b   : > { %v2191_v47 = vpop.eup %2190  ;;  %v1315_v55 = vsel %vm1175_vm4, %v924_v37, 0  ;;  %v2177_v37 = vld [vmem:[%s3070_s14 + $0x8] sm:$0xff]  }
 0x44c   : > { %v1165_v48 = vmul.f32 %v2191_v47, %v2183_v32  ;;  %v2175_v32 = vld [vmem:[%s3068_s12 + $0x8] sm:$0xff]  }
 0x44d   : > { %v916_v49 = vpop.permute.xlu0 %915 }
 0x44e   : > { %v923_v50 = vpack.c.bf16 %v916_v49, %v916_v49  ;;  %v1169_v51 = vpack.c.bf16 %v1165_v48, %v1165_v48  ;;  %v2176_v48 = vld [vmem:[%s3070_s14] sm:$0xff]   ;;  %v2178_v49 = vld [vmem:[%s3070_s14 + $0x10] sm:$0xff]  }
 0x44f   : > { %v2193_v52 = vpop.eup %2192 }
 0x450   : > { %v1269_v53 = vsel %vm1175_vm4, %v923_v50, 0  ;;  %v1166_v54 = vmul.f32 %v2193_v52, %v2185_v34  ;;  %1981 = vmatmul.mubr.msk.bf16.vlgmr.msra.gmra.mrb[16].mxu0 %vm925_vm3, %v1169_v51  ;;  %v2179_v50 = vld [vmem:[%s3070_s14 + $0x18] sm:$0xff]   ;;  %v1871_v51 = vld [vmem:[%s3128_s22] ss:$0 sm:$0xff]  ;;  %s3133_s22 = sld [smem:[#allocation41_spill]] }
 0x451   : > { %1985 = vmatpush3.bf16.msra.mxu1 %v1269_v53  ;;  %1991 = vmatpush3.bf16.msra.mxu0 %v1315_v55 }
 0x452   : > { %1992 = vmatprep.mubr.msk.bf16.mxu0 %vm2491_vm1, %v2490_v2  ;;  %v1170_v56 = vpack.c.bf16 %v1166_v54, %v1166_v54  ;;  %1996 = vmatprep.subr.bf16.mxu1 %v2490_v2 }
 0x453   : > { %2004 = vmatprep.subr.bf16.mxu0 %v2490_v2 }
 0x454   : > { %v2195_v57 = vpop.eup %2194  ;;  %1987 = vmatmul.mubr.msk.bf16.vlgmr.msra.gmra.mrb[16].mxu1 %vm925_vm3, %v1170_v56 }
 0x455   : > { %v1167_v58 = vmul.f32 %v2195_v57, %v2187_v36  ;;  %2000 = vmatprep.mubr.msk.bf16.mxu1 %vm2491_vm1, %v2490_v2  ;;  %1997 = vmatpush3.bf16.msra.mxu1 %v2172_v0 }
 0x456   : > { %1998 = vmatprep.subr.bf16.mxu1 %v2490_v2 }
 0x457   : > { %v1171_v59 = vpack.c.bf16 %v1167_v58, %v1167_v58 }
 0x459   : > { %1993 = vmatmul.mubr.msk.bf16.vlgmr.msra.gmra.mrb[20].mxu0 %vm925_vm3, %v1171_v59  ;;  %1999 = vmatpush3.bf16.msra.mxu1 %v2173_v1 }
 0x45a   : > { %2008 = vmatprep.mubr.msk.bf16.mxu0 %vm2491_vm1, %v2490_v2  ;;  %2012 = vmatprep.subr.bf16.mxu1 %v2490_v2 }
 0x45b   : > { %2005 = vmatpush3.bf16.msra.mxu0 %v2174_v31 }
 0x45c   : > { %2006 = vmatprep.subr.bf16.mxu0 %v2490_v2 }
 0x45f   : > { %2007 = vmatpush3.bf16.msra.mxu0 %v2175_v32 }
 0x4ba   : > { %v1213_v60 = vpop.f32.mrb[12].mxu1 }
 0x4bb   : > { %1357 = vst.msk [vmem:[#allocation3] sm:$0xff] %vm925_vm3, %v1213_v60  ;;  %v1976_v61 = vpop.f32.mrb[13].mxu1 }
 0x4bc   : > { %v1216_v62 = vpop.f32.mrb[14].mxu1 }
 0x4bd   : > { %v1977_v63 = vpop.f32.mrb[15].mxu1  ;;  %v1875_v62 = vld [vmem:[%s3129_s20] ss:$0 sm:$0xff]  ;;  %s2498_s20 = smov [#allocation15]  }
 0x4be   : > { %s2374_s16 = sshll.u32 %s2498_s20, 4  ;;  %s2375_s16 = int_to_ptr.vmem [resolvable:$false] %s2374_s16 }
 0x4bf   : > { %p2377_p5 = scmp.lt.s32.totalorder %s2999_s23, %s2375_s16 }
 0x523   : > { %v1259_v3 = vpop.f32.mrb[16].mxu0 }
 0x524   : > { %1359 = vrot.lane.b32.xlu1 %v1259_v3, %s2495_s24  ;;  %v1982_v4 = vpop.f32.mrb[17].mxu0 }
 0x525   : > { %v1262_v5 = vpop.f32.mrb[18].mxu0 }
 0x526   : > { %v1983_v7 = vpop.f32.mrb[19].mxu0 }
 0x527   : > { %v1305_v8 = vpop.f32.mrb[16].mxu1 }
 0x528   : > { %1365 = vrot.lane.b32.xlu0 %v1305_v8, %s2496_s19  ;;  %v1988_v9 = vpop.f32.mrb[17].mxu1  ;;  %s3132_s19 = sld [smem:[#allocation40_spill]] }
 0x529   : > { %v1308_v10 = vpop.f32.mrb[18].mxu1 }
 0x52a   : > { %v1989_v11 = vpop.f32.mrb[19].mxu1 }
 0x52c   : > { %v1351_v12 = vpop.f32.mrb[20].mxu0 }
 0x52d   : > { %1371 = vrot.lane.b32.xlu1 %v1351_v12, %s2497_s1  ;;  %v1994_v13 = vpop.f32.mrb[21].mxu0  ;;  %s1885_s1 = sshll.u32 %s1679_s17, 7  ;;  %s2376_s17 = scalar_lea.vmem %s2375_s16, 256 }
 0x52e   : > { %v1354_v14 = vpop.f32.mrb[22].mxu0  ;;  %s2997_s0 = scalar_lea.hbm %s3133_s22, %s1885_s1  ;;  %p2378_p6 = scmp.lt.s32.totalorder %s2376_s17, %s2370_s15 }
 0x52f   : > { %v1995_v15 = vpop.f32.mrb[23].mxu0 }
 0x530   : > { %p2379_p7 = por %p2378_p6, %p2377_p5 }
 0x532   : > { %p2380_p9 = pnand %p2379_p7, %p2373_p4 }
 0x596   : > { %v1360_v16 = vpop.permute.xlu1 %1359 }
 0x597   : > { %1363 = vst.msk [vmem:[#allocation3] sm:$0xff] %vm1362_vm5, %v1360_v16 }
 0x59a   : > { %v1366_v17 = vpop.permute.xlu0 %1365 }
 0x59b   : > { %1369 = vst.msk [vmem:[#allocation3] sm:$0xff] %vm1368_vm6, %v1366_v17 }
 0x59f   : > { %v1372_v18 = vpop.permute.xlu1 %1371 }
 0x5a0   : > { %1375 = vst.msk [vmem:[#allocation3] sm:$0xff] %vm1374_vm7, %v1372_v18 }
 0x5a7   : > { %v1376_v19 = vld [vmem:[#allocation3] sm:$0xff] }
 0x5a8   : > { %v1377_v20 = vpack.c.bf16 %v1376_v19, %v1376_v19  ;;  %v1881_v19 = vld [vmem:[%s3131_s13] ss:$0 sm:$0xff] }
 0x5aa   : > { %2001 = vmatmul.mubr.msk.bf16.vlgmr.msra.gmra.mrb[20].mxu1 %vm713_vm2, %v1377_v20 }
 0x5ab   : > { %2020 = vmatprep.mubr.msk.bf16.mxu1 %vm2491_vm1, %v2490_v2  ;;  %2013 = vmatpush3.bf16.msra.mxu1 %v2176_v48 }
 0x5ac   : > { %2014 = vmatprep.subr.bf16.mxu1 %v2490_v2 }
 0x5af   : > { %2015 = vmatpush3.bf16.msra.mxu1 %v2177_v37 }
 0x5b0   : > { %2016 = vmatprep.subr.bf16.mxu1 %v2490_v2 }
 0x5b3   : > { %2017 = vmatpush3.bf16.msra.mxu1 %v2178_v49 }
 0x5b4   : > { %2018 = vmatprep.subr.bf16.mxu1 %v2490_v2 }
 0x5b7   : > { %2019 = vmatpush3.bf16.msra.mxu1 %v2179_v50 }
 0x67d   : > { %v1438_v22 = vpop.f32.mrb[20].mxu1 }
 0x67e   : > { %v1439_v23 = vadd.f32 %v1865_v21, %v1438_v22  ;;  %v2002_v24 = vpop.f32.mrb[21].mxu1  ;;  %v1882_v21 = vld [vmem:[%s3132_s19] ss:$0 sm:$0xff] }
 0x67f   : > { %v1441_v25 = vpop.f32.mrb[22].mxu1 }
 0x680   : > { %v1444_v26 = vadd.f32 %v1439_v23, %v2852_v6  ;;  %v2003_v27 = vpop.f32.mrb[23].mxu1 }
 0x682   : > { %v1445_v28 = vsel %vm713_vm2, %v1444_v26, 0.0  ;;  %v1450_v29 = vmul.f32 %v1444_v26, %v1444_v26 }
 0x683   : > { %1446 = vadd.xlane.f32.xlu0 %v1445_v28 }
 0x684   : > { %v1451_v30 = vsel %vm713_vm2, %v1450_v29, 0.0 }
 0x685   : > { %1452 = vadd.xlane.f32.xlu1 %v1451_v30 }
 0x710   : > { %v1447_v6 = vpop.xlane.xlu0 %1446 }
 0x711   : > { %v1449_v33 = vmul.f32 0.03125, %v1447_v6 }
 0x712   : > { %v1453_v34 = vpop.xlane.xlu1 %1452 }
 0x713   : > { %v1455_v35 = vmul.f32 %v1449_v33, %v1449_v33  ;;  %v1454_v36 = vmul.f32 0.03125, %v1453_v34  ;;  %v1460_v40 = vsub.f32 %v1444_v26, %v1449_v33 }
 0x715   : > { %v1456_v38 = vsub.f32 %v1454_v36, %v1455_v35 }
 0x717   : > { %v1457_v39 = vadd.f32 1e-12, %v1456_v38 }
 0x719   : > { %2196 = vrsqrt.f32 %v1457_v39 }
 0x723   : > { %v2197_v41 = vpop.eup %2196 }
 0x724   : > { %v1461_v43 = vmul.f32 %v2197_v41, %v1460_v40 }
 0x726   : > { %v1468_v45 = vmul.f32 %v1869_v42, %v1461_v43 }
 0x728   : > { %v1476_v46 = vadd.f32 %v1870_v44, %v1468_v45 }
 0x72a   : > { %v1477_v47 = vpack.c.bf16 %v1476_v46, %v1476_v46 }
 0x72c   : > { %2009 = vmatmul.mubr.msk.bf16.vlgmr.msra.gmra.mrb[24].mxu0 %vm713_vm2, %v1477_v47 }
 0x7ff   : > { %v1538_v52 = vpop.f32.mrb[24].mxu0 }
 0x800   : > { %v1539_v53 = vadd.f32 %v1871_v51, %v1538_v52  ;;  %v2010_v54 = vpop.f32.mrb[25].mxu0 }
 0x801   : > { %v1541_v55 = vpop.f32.mrb[26].mxu0 }
 0x802   : > { %v1545_v56 = vmul.f32 0.70710677, %v1539_v53  ;;  %v2011_v57 = vpop.f32.mrb[27].mxu0  ;;  %v1544_v59 = vmul.f32 0.5, %v1539_v53 }
 0x804   : > { %2198 = verf.f32 %v1545_v56 }
 0x80e   : > { %v2199_v58 = vpop.eup %2198 }
 0x80f   : > { %v1547_v60 = vadd.f32 1.0, %v2199_v58 }
 0x811   : > { %v1548_v2 = vmul.f32 %v1547_v60, %v1544_v59 }
 0x813   : > { %v1549_v61 = vpack.c.bf16 %v1548_v2, %v1548_v2 }
 0x815   : > { %2021 = vmatmul.mubr.msk.bf16.vlgmr.msra.gmra.mrb[24].mxu1 %vm1589_vm8, %v1549_v61 }
 0x8e8   : > { %v1627_v63 = vpop.f32.mrb[24].mxu1 }
 0x8e9   : > { %v1628_v0 = vadd.f32 %v1875_v62, %v1627_v63  ;;  %v2022_v1 = vpop.f32.mrb[25].mxu1 }
 0x8ea   : > { %v1630_v3 = vpop.f32.mrb[26].mxu1 }
 0x8eb   : > { %v1633_v4 = vadd.f32 %v1628_v0, %v1476_v46  ;;  %v2023_v5 = vpop.f32.mrb[27].mxu1 }
 0x8ed   : > { %v1634_v7 = vsel %vm713_vm2, %v1633_v4, 0.0  ;;  %v1638_v8 = vmul.f32 %v1633_v4, %v1633_v4 }
 0x8ee   : > { %1635 = vadd.xlane.f32.xlu0 %v1634_v7 }
 0x8ef   : > { %v1639_v9 = vsel %vm713_vm2, %v1638_v8, 0.0 }
 0x8f2   : > { %1640 = vadd.xlane.f32.xlu0 %v1639_v9 }
 0x97b   : > { %v1636_v10 = vpop.xlane.xlu0 %1635 }
 0x97c   : > { %v1637_v11 = vmul.f32 0.03125, %v1636_v10 }
 0x97e   : > { %v1643_v13 = vmul.f32 %v1637_v11, %v1637_v11  ;;  %v1648_v17 = vsub.f32 %v1633_v4, %v1637_v11 }
 0x97f   : > { %v1641_v12 = vpop.xlane.xlu0 %1640 }
 0x980   : > { %v1642_v14 = vmul.f32 0.03125, %v1641_v12 }
 0x982   : > { %v1644_v15 = vsub.f32 %v1642_v14, %v1643_v13 }
 0x984   : > { %v1645_v16 = vadd.f32 1e-12, %v1644_v15 }
 0x986   : > { %2200 = vrsqrt.f32 %v1645_v16 }
 0x990   : > { %v2201_v18 = vpop.eup %2200 }
 0x991   : > { %v1649_v20 = vmul.f32 %v2201_v18, %v1648_v17 }
 0x993   : > { %v1656_v22 = vmul.f32 %v1881_v19, %v1649_v20 }
 0x995   : > { %v1664_v23 = vadd.f32 %v1882_v21, %v1656_v22 }
 0x997   : > { %1665 = vst.msk [vmem:[#allocation2] sm:$0xff] %vm713_vm2, %v1664_v23  ;;  %1666 = vst.msk [vmem:[%s671_s5] sm:$0xff] %vm713_vm2, %v1664_v23 }
 0x998   : > { %2383 = shalt.err (!%p2380_p9)
}
 0x999   : > { %s2384_s18 = scalar_lea.hbm %s2997_s0, 128  ;;  %s2388_s27 = scalar_lea.hbm %s3133_s22, 512 }
 0x99a   : > { %p2385_p11 = scmp.ne.s32.totalorder %s2997_s0, %s2384_s18  ;;  %p2389_p3 = scmp.lt.u32.totalorder %s2997_s0, %s3133_s22 }
 0x99b   : > { %p2390_p0 = scmp.lt.u32.totalorder %s2388_s27, %s2384_s18  ;;  %p2392_p8 = scmp.lt.u32.totalorder %s2384_s18, %s2997_s0 }
 0x99c   : > { %p2386_p13 = pnand %p2385_p11, %p3134_p10 }
 0x99d   : > { %p2391_p2 = por %p2390_p0, %p2389_p3 }
 0x99e   : > { %p2387_p1 = pneg %p2386_p13 }
 0x99f   : > { %p2393_p12 = por %p2392_p8, %p2391_p2 }
 0x9a1   : > { %p2394_p4 = pnand %p2393_p12, %p2387_p1 }
 0x9a3   : > { %2397 = shalt.err (!%p2394_p4)
}
 0x9a4   : > { %2048 = dma.vmem_to_hbm [thread:$0]  (%p3134_p10), %s2999_s23, 128, %s2997_s0, %s1668_s26  }
 0x9a5 PF: > { %s3135_s21 = sld [smem:[#allocation25_spill]]  ;;  %s3136_s24 = sld [smem:[#allocation21_spill]] }
 0x9a6   : > { %s3137_s19 = sld [smem:[#allocation29_spill]] }
 0x9ab   : > { %p2085_p5 = scmp.ge.s32.totalorder %s3135_s21, 2  ;;  %s1695_s1 = sand.u32 1, %s3136_s24  }
 0x9ac   : > { %p3138_p6 = scmp.ne.s32.totalorder %s3137_s19, 0  ;;  %s1696_s29 = scalar_lea.sflag [#allocation6], %s1695_s1 }
 0x9ae   : > { %p2070_p7 = pnand %p2085_p5, %p3138_p6 }
 0x9b0   : > { %2447 = dma.done.wait (!%p2070_p7), %s1696_s29, 128  }
 0x9b1   : > { %2449 = vsyncadd (!%p2070_p7), %s1696_s29, 4294967168  ;;  %s35_s20 = sadd.s32 1, %s3135_s21   ;;  %s3139_s30 = sld [smem:[#allocation22_spill]] }
 0x9b2   : > { %p32_p9 = scmp.ge.s32.totalorder %s35_s20, 6   ;;  %s3140_s29 = sld [smem:[#allocation30_spill]] }
 0x9b3   : > { %s3141_s3 = sld [smem:[#allocation23_spill]]  ;;  %s3142_s0 = sld [smem:[#allocation24_spill]] }
 0x9b4   : > { %s3143_s19 = sld [smem:[#allocation26_spill]]  ;;  %s3144_s1 = sld [smem:[#allocation28_spill]] }
 0x9b5   : > { %s3145_s27 = smov %s2456_s28  ;;  %34 = sbr.rel (!%p32_p9) target bundleno = 21 (0x15), region = 159 }
 0x9b7   : > { %s3146_s28 = smov %s3139_s30 }
 0x9b9   : > { %s3147_s30 = smov %s3141_s3 }
 0x9bc   :  { %1701 = vsyncpa [#allocation5], 1 }
 0x9bd   :  { %1703 = vsyncpa [#allocation5 + $0x1], 1 }
 0x9be   :  { %1704 = vsyncpa [#allocation8], 1 }
 0x9bf   :  { %1705 = vsyncpa [#allocation11], 1 }
 0x9c0   :  { %1706 = vsyncpa [#allocation14], 1 }
 0x9c1   :  { %1707 = vsyncpa [#allocation6], 1 }
 0x9c2   :  { %1709 = vsyncpa [#allocation6 + $0x1], 1 }

</bundles_post_ra>
